<compile_context>
chip_gen: v7x
topology: tpu7x:2x2x1
jax: 0.10.0
libtpu: 0.0.40
codegen_flags: <defaults>
</compile_context>

<pallas_src>
import jax
import jax.numpy as jnp
from jax import lax
from jax.experimental import pallas as pl
from jax.experimental.pallas import tpu as pltpu


# ---------------------------------------------------------------------------
# Generation-aware policies
# ---------------------------------------------------------------------------
def _device_kind():
    try:
        return jax.devices()[0].device_kind.lower()
    except Exception:
        return ""


def _vmem_limit_bytes():
    kind = _device_kind()
    if "v7" in kind:
        return 48 * 1024 * 1024       # headroom below v7x's 64 MiB per-TC VMEM
    if "v6" in kind or "v5" in kind:
        return 100 * 1024 * 1024      # v5e/v6e have 128 MiB physical VMEM
    return None                        # other generations: keep the compiler default


def _default_num_batch_tiles():
    # 2-way "parallel" batch split only pays off on v7x (2 TensorCores per chip); on
    # single-TC parts it halves MXU row occupancy and re-streams the adjacency.
    return 2 if "v7" in _device_kind() else 1


# ---------------------------------------------------------------------------
# Fused GNN message-passing kernel (one grid step per (batch tile, layer))
# ---------------------------------------------------------------------------
def _make_decoder_kernel(num_layers, batch_tile, num_messages, hidden_dim, compute_dtype):
    L, BT, M, D = num_layers, batch_tile, num_messages, hidden_dim
    R = BT * M
    prec = lax.Precision.HIGHEST if compute_dtype == jnp.float32 else None

    def dot(a, b):
        return jnp.dot(a, b, precision=prec, preferred_element_type=jnp.float32)

    def kernel(feat_ref, emb_ref, a_ref,
               wv1a_ref, wv1b_ref, wc1a_ref, wc1b_ref, bv1_ref, bc1_ref,
               wv2_ref, wc2_ref, b2_ref, outw_ref,
               out_ref, x_scratch, *agg_scratch):
        l = pl.program_id(1)

        @pl.when(l == 0)
        def _():
            x_scratch[...] = feat_ref[...].astype(jnp.float32)

        x = x_scratch[...]                                       # (R, D) f32 running features
        emb = emb_ref[0]                                         # (M, D) f32 type embeddings

        # Broadcast-add the type embeddings over the batch tile (no BT-tiled copy in HBM).
        combined = x.reshape(BT, M, D) + emb[None]
        cb = combined.astype(compute_dtype)                      # (BT, M, D)
        cbf = cb.reshape(R, D)

        a_stack = a_ref[...]                                     # (2M, M) = [A_v2c ; A_c2v]

        # Message aggregation.  Stacked adjacency -> one matmul per batch; the two halves
        # are taken by sublane-aligned slices / sliced scratch stores (no concatenates).
        if BT == 1:
            agg = dot(a_stack, cbf).astype(compute_dtype)        # (2M, D)
            mv, mc = agg[:M], agg[M:]
        else:
            mv_s, mc_s = agg_scratch
            for b in range(BT):                                  # static unroll over the tile
                agg = dot(a_stack, cb[b]).astype(compute_dtype)  # (2M, D)
                mv_s[b * M:(b + 1) * M, :] = agg[:M]
                mc_s[b * M:(b + 1) * M, :] = agg[M:]
            mv, mc = mv_s[...], mc_s[...]

        # Branch MLPs with the block-diagonal first Linear split into two (R,D)@(D,D)
        # matmuls per branch (no zero blocks, no (R, 2D) intermediate).
        hv = dot(cbf, wv1a_ref[0]) + dot(mv, wv1b_ref[0]) + bv1_ref[0]
        hv = jnp.maximum(hv, 0.0).astype(compute_dtype)
        hc = dot(cbf, wc1a_ref[0]) + dot(mc, wc1b_ref[0]) + bc1_ref[0]
        hc = jnp.maximum(hc, 0.0).astype(compute_dtype)

        y = dot(hv, wv2_ref[0]) + dot(hc, wc2_ref[0]) + b2_ref[0]   # (R, D) f32

        x_new = jnp.where(l > 0, y + x, y)                       # residual only for iters > 0
        x_scratch[...] = x_new

        @pl.when(l == L - 1)                                     # fused output projection
        def _():
            dec = jnp.sum(x_new * outw_ref[...], axis=-1, keepdims=True)   # (R, 1) f32
            out_ref[...] = dec

    return kernel


def _run_gnn_stack(message_features, emb_per_layer, a_stack, layer_stacks, out_w,
                   compute_dtype, num_batch_tiles=None):
    """Runs all GNN iterations + output projection.

    message_features: (B, M, D) f32  ->  decoded message LLRs (B, M) f32.
    """
    B, M, D = message_features.shape
    L = emb_per_layer.shape[0]

    num_steps = int(num_batch_tiles) if num_batch_tiles is not None else _default_num_batch_tiles()
    num_steps = max(num_steps, 1)
    if B % num_steps != 0 or ((B // num_steps) * M) % 8 != 0:
        num_steps = 1                                     # keep feature blocks sublane-aligned
    BT = B // num_steps
    R = BT * M

    (wv1a, wv1b, wc1a, wc1b, bv1, bc1, wv2, wc2, b2) = layer_stacks
    cdt = compute_dtype
    feat_flat = message_features.reshape(B * M, D).astype(jnp.float32)

    def const_spec(shape):                    # block index never changes across the grid
        n = len(shape)
        return pl.BlockSpec(shape, lambda i, l, _n=n: (0,) * _n)

    def layer_spec(shape):                    # (L, ...) arrays: one layer resident at a time
        n = len(shape)
        return pl.BlockSpec((1,) + tuple(shape[1:]),
                            lambda i, l, _n=n: (l,) + (0,) * (_n - 1))

    scratch = [pltpu.VMEM((R, D), jnp.float32)]           # running feature accumulator
    if BT > 1:
        scratch += [pltpu.VMEM((R, D), cdt), pltpu.VMEM((R, D), cdt)]   # mv / mc scratch

    out_flat = pl.pallas_call(
        _make_decoder_kernel(L, BT, M, D, cdt),
        out_shape=jax.ShapeDtypeStruct((B * M, 1), jnp.float32),
        grid=(num_steps, L),
        in_specs=[
            pl.BlockSpec((R, D), lambda i, l: (i, 0)),    # message features (read at l==0 only)
            layer_spec(emb_per_layer.shape),              # (L, M, D) f32 type embeddings
            const_spec(a_stack.shape),                    # (2M, M) stacked adjacency
            layer_spec(wv1a.shape), layer_spec(wv1b.shape),
            layer_spec(wc1a.shape), layer_spec(wc1b.shape),
            layer_spec(bv1.shape), layer_spec(bc1.shape),
            layer_spec(wv2.shape), layer_spec(wc2.shape),
            layer_spec(b2.shape),
            const_spec(out_w.shape),                      # (1, D) final output projection
        ],
        out_specs=pl.BlockSpec((R, 1), lambda i, l: (i, 0)),
        scratch_shapes=scratch,
        compiler_params=pltpu.CompilerParams(
            dimension_semantics=("parallel", "arbitrary"),
            vmem_limit_bytes=_vmem_limit_bytes()),
    )(feat_flat,
      emb_per_layer.astype(jnp.float32),
      a_stack.astype(cdt),
      wv1a.astype(cdt), wv1b.astype(cdt), wc1a.astype(cdt), wc1b.astype(cdt),
      bv1.astype(jnp.float32), bc1.astype(jnp.float32),
      wv2.astype(cdt), wc2.astype(cdt), b2.astype(jnp.float32),
      out_w.astype(jnp.float32))
    return out_flat.reshape(B, M)


# ---------------------------------------------------------------------------
# Wrapper-side glue
# ---------------------------------------------------------------------------
def _fix_adjacency(adj, M):
    # Mirrors the module's silent zero-pad/truncate of mismatched adjacency shapes.
    adj = adj.astype(jnp.float32)
    if adj.shape == (M, M):
        return adj
    s = min(adj.shape[0], M)
    return jnp.zeros((M, M), jnp.float32).at[:s, :s].set(adj[:s, :s])


def _pad_message_types(message_types, M):
    mt = message_types.astype(jnp.int32)
    if mt.shape[0] < M:
        mt = jnp.concatenate([mt, jnp.zeros((M - mt.shape[0],), jnp.int32)])
    elif mt.shape[0] > M:
        mt = mt[:M]
    return mt


def _stack_layer_params(layer_params):
    """Per-layer weight stacks, with the first Linear split into its block-diagonal halves."""
    D = layer_params[0]['v2c_w2'].shape[0]
    wv1a, wv1b, wc1a, wc1b = [], [], [], []
    bv1, bc1, wv2, wc2, b2 = [], [], [], [], []
    for lp in layer_params:
        wv1a.append(lp['v2c_w1'][:, :D].T)            # combined-part of var_to_check_update
        wv1b.append(lp['v2c_w1'][:, D:].T)            # aggregated-part
        wc1a.append(lp['c2v_w1'][:, :D].T)
        wc1b.append(lp['c2v_w1'][:, D:].T)
        bv1.append(lp['v2c_b1'][None, :])
        bc1.append(lp['c2v_b1'][None, :])
        wv2.append(lp['v2c_w2'].T)
        wc2.append(lp['c2v_w2'].T)
        b2.append((lp['v2c_b2'] + lp['c2v_b2'])[None, :])
    return tuple(map(jnp.stack, (wv1a, wv1b, wc1a, wc1b, bv1, bc1, wv2, wc2, b2)))


def message_gnn_decoder_forward(params, input_llr, message_to_var_mapping,
                                message_types=None, var_to_check_adjacency=None,
                                check_to_var_adjacency=None, ground_truth=None,
                                compute_dtype=jnp.bfloat16, num_batch_tiles=None):
    """Pallas-backed MessageGNNDecoder.forward."""
    layer_params = params['layers']

    var_idx = (message_to_var_mapping[:, 0] if message_to_var_mapping.ndim > 1
               else message_to_var_mapping).astype(jnp.int32)
    M = var_idx.shape[0]
    B, V = input_llr.shape

    # message initialisation + input embedding Linear(1, D)
    message_llrs = jnp.take(input_llr, var_idx, axis=1)                        # (B, M)
    feats = message_llrs[..., None] * params['in_w'][:, 0] + params['in_b']    # (B, M, D)

    if message_types is None:
        message_types = jnp.zeros((M,), jnp.int32)
    mt = _pad_message_types(message_types, M)
    emb_per_layer = jnp.stack([
        lp['emb'][jnp.clip(mt, 0, lp['emb'].shape[0] - 1)] for lp in layer_params])

    A_v2c = _fix_adjacency(var_to_check_adjacency, M)
    A_c2v = _fix_adjacency(check_to_var_adjacency, M)
    a_stack = jnp.concatenate([A_v2c, A_c2v], axis=0)                          # (2M, M)

    layer_stacks = _stack_layer_params(layer_params)
    last = layer_params[-1]

    decoded = _run_gnn_stack(feats.astype(jnp.float32), emb_per_layer, a_stack,
                             layer_stacks, last['out_w'], compute_dtype,
                             num_batch_tiles=num_batch_tiles)                  # (B, M)
    decoded = decoded + last['out_b'][0]

    # scatter-sum message LLRs to variable bits (SUM aggregation), add channel LLR, sigmoid
    var_llrs = jnp.zeros((B, V), jnp.float32).at[:, var_idx].add(decoded)
    probs = jax.nn.sigmoid(var_llrs + input_llr)

    if ground_truth is not None:
        gt = ground_truth.astype(jnp.float32)
        p = jnp.clip(probs, 1e-7, 1.0 - 1e-7)
        loss = -jnp.mean(gt * jnp.log(p) + (1.0 - gt) * jnp.log(1.0 - p))
        return probs, loss
    return probs


# ---------------------------------------------------------------------------
# Pure-JAX f32 reference (mirrors the PyTorch module)
# ---------------------------------------------------------------------------
def _reference_forward(params, input_llr, message_to_var_mapping, message_types=None,
                       var_to_check_adjacency=None, check_to_var_adjacency=None):
    var_idx = (message_to_var_mapping[:, 0] if message_to_var_mapping.ndim > 1
               else message_to_var_mapping).astype(jnp.int32)
    M = var_idx.shape[0]
    B, V = input_llr.shape
    msg_llrs = jnp.take(input_llr, var_idx, axis=1)
    feats = msg_llrs[..., None] * params['in_w'][:, 0] + params['in_b']
    if message_types is None:
        message_types = jnp.zeros((M,), jnp.int32)
    mt = _pad_message_types(message_types, M)
    A_v2c = _fix_adjacency(var_to_check_adjacency, M)
    A_c2v = _fix_adjacency(check_to_var_adjacency, M)

    def mlp(x, w1, b1_, w2, b2_):
        h = jnp.maximum(x @ w1.T + b1_, 0.0)
        return h @ w2.T + b2_

    with jax.default_matmul_precision("float32"):
        for i, lp in enumerate(params['layers']):
            emb = lp['emb'][jnp.clip(mt, 0, lp['emb'].shape[0] - 1)]
            combined = feats + emb[None]
            mv = jnp.einsum('mn,bnd->bmd', A_v2c, combined)
            hv = mlp(jnp.concatenate([combined, mv], axis=-1),
                     lp['v2c_w1'], lp['v2c_b1'], lp['v2c_w2'], lp['v2c_b2'])
            mc = jnp.einsum('mn,bnd->bmd', A_c2v, combined)
            hc = mlp(jnp.concatenate([combined, mc], axis=-1),
                     lp['c2v_w1'], lp['c2v_b1'], lp['c2v_w2'], lp['c2v_b2'])
            new = hv + hc
            if i > 0:
                new = new + feats
            feats = new
        last = params['layers'][-1]
        decoded = jnp.einsum('bmd,d->bm', feats, last['out_w'][0]) + last['out_b'][0]
    var_llrs = jnp.zeros((B, V), jnp.float32).at[:, var_idx].add(decoded)
    return jax.nn.sigmoid(var_llrs + input_llr)


def init_params(key, num_iterations, hidden_dim, num_message_types):
    D = hidden_dim
    keys = jax.random.split(key, num_iterations + 2)

    def uni(k, shape, bound):
        return jax.random.uniform(k, shape, jnp.float32, -bound, bound)

    k_in = jax.random.split(keys[0], 2)
    k_out = jax.random.split(keys[1], 2)
    s1 = 1.0 / (2.0 * D) ** 0.5
    s2 = 1.0 / float(D) ** 0.5
    layers = []
    for i in range(num_iterations):
        ks = jax.random.split(keys[2 + i], 11)
        layers.append({
            'emb': jax.random.normal(ks[0], (num_message_types, D), jnp.float32),
            'v2c_w1': uni(ks[1], (D, 2 * D), s1), 'v2c_b1': uni(ks[2], (D,), s1),
            'v2c_w2': uni(ks[3], (D, D), s2),     'v2c_b2': uni(ks[4], (D,), s2),
            'c2v_w1': uni(ks[5], (D, 2 * D), s1), 'c2v_b1': uni(ks[6], (D,), s1),
            'c2v_w2': uni(ks[7], (D, D), s2),     'c2v_b2': uni(ks[8], (D,), s2),
            'out_w': uni(ks[9], (1, D), s2),      'out_b': uni(ks[10], (1,), s2),
        })
    return {
        'in_w': uni(k_in[0], (D, 1), 1.0), 'in_b': uni(k_in[1], (D,), 1.0),
        'layers': layers,
        # decoder-level output_layer exists in the module but is never used in forward
        'out_layer_w': uni(k_out[0], (1, D), s2), 'out_layer_b': uni(k_out[1], (1,), s2),
    }


if __name__ == "__main__":
    D = 32
    num_iterations = 5
    num_message_types = 4

    key = jax.random.PRNGKey(0)
    k_p, k_llr, k_map, k_types, k_a1, k_a2, k_llr2 = jax.random.split(key, 7)

    params = init_params(k_p, num_iterations, D, num_message_types)

    B, V, M = 2, 8, 16
    input_llr = jax.random.normal(k_llr, (B, V), jnp.float32)
    message_to_var_mapping = jax.random.randint(k_map, (M,), 0, V)
    message_types = jax.random.randint(k_types, (M,), 0, num_message_types)
    var_to_check_adjacency = (jax.random.uniform(k_a1, (M, M)) > 0.7).astype(jnp.float32)
    check_to_var_adjacency = (jax.random.uniform(k_a2, (M, M)) > 0.7).astype(jnp.float32)

    fwd = jax.jit(message_gnn_decoder_forward,
                  static_argnames=("compute_dtype", "num_batch_tiles"))

    ref = _reference_forward(params, input_llr, message_to_var_mapping, message_types,
                             var_to_check_adjacency, check_to_var_adjacency)

    # f32-operand kernel run (device-default batch-tile policy): structural check.
    out_f32 = jax.block_until_ready(
        fwd(params, input_llr, message_to_var_mapping, message_types,
            var_to_check_adjacency, check_to_var_adjacency,
            compute_dtype=jnp.float32))
    assert out_f32.shape == (B, V)
    err_f32 = float(jnp.max(jnp.abs(out_f32 - ref)))
    assert err_f32 < 1e-2, f"f32 kernel mismatch vs reference: {err_f32}"

    # Default bf16-operand run (f32 accumulation): looser tolerance.
    out_bf16 = jax.block_until_ready(
        fwd(params, input_llr, message_to_var_mapping, message_types,
            var_to_check_adjacency, check_to_var_adjacency,
            compute_dtype=jnp.bfloat16))
    err_bf16 = float(jnp.max(jnp.abs(out_bf16 - ref)))
    assert err_bf16 < 7e-2, f"bf16 kernel mismatch vs reference: {err_bf16}"

    # Forced 2-way batch split: exercises the multi-tile grid AND the BT>1 in-kernel
    # aggregation-scratch path (review's untested-branch concern).
    B2 = 4
    input_llr2 = jax.random.normal(k_llr2, (B2, V), jnp.float32)
    ref2 = _reference_forward(params, input_llr2, message_to_var_mapping, message_types,
                              var_to_check_adjacency, check_to_var_adjacency)
    out_split = jax.block_until_ready(
        fwd(params, input_llr2, message_to_var_mapping, message_types,
            var_to_check_adjacency, check_to_var_adjacency,
            compute_dtype=jnp.float32, num_batch_tiles=2))
    err_split = float(jnp.max(jnp.abs(out_split - ref2)))
    assert err_split < 1e-2, f"batch-split kernel mismatch vs reference: {err_split}"

    print("KERNEL_OK")
</pallas_src>

<mosaic_0001>
module attributes {stable_mosaic.version = 11 : i64} {
  func.func @kernel(%arg0: i32, %arg1: i32, %arg2: memref<32x32xf32, #tpu.memory_space<vmem>>, %arg3: memref<1x16x32xf32, #tpu.memory_space<vmem>>, %arg4: memref<32x16xf32, #tpu.memory_space<vmem>>, %arg5: memref<1x32x32xf32, #tpu.memory_space<vmem>>, %arg6: memref<1x32x32xf32, #tpu.memory_space<vmem>>, %arg7: memref<1x32x32xf32, #tpu.memory_space<vmem>>, %arg8: memref<1x32x32xf32, #tpu.memory_space<vmem>>, %arg9: memref<1x1x32xf32, #tpu.memory_space<vmem>>, %arg10: memref<1x1x32xf32, #tpu.memory_space<vmem>>, %arg11: memref<1x32x32xf32, #tpu.memory_space<vmem>>, %arg12: memref<1x32x32xf32, #tpu.memory_space<vmem>>, %arg13: memref<1x1x32xf32, #tpu.memory_space<vmem>>, %arg14: memref<1x32xf32, #tpu.memory_space<vmem>>, %arg15: memref<32x1xf32, #tpu.memory_space<vmem>>, %arg16: memref<32x32xf32, #tpu.memory_space<vmem>>, %arg17: memref<32x32xf32, #tpu.memory_space<vmem>>, %arg18: memref<32x32xf32, #tpu.memory_space<vmem>>) attributes {dimension_semantics = [#tpu.dimension_semantics<parallel>, #tpu.dimension_semantics<arbitrary>], iteration_bounds = array<i64: 1, 5>, scalar_prefetch = 0 : i64, scratch_operands = 3 : i64, tpu.core_type = #tpu.core_type<tc>, window_params = [{transform_indices = @transform_0, window_bounds = array<i64: 32, 32>}, {transform_indices = @transform_1, window_bounds = array<i64: 1, 16, 32>}, {pipeline_mode = #tpu.pipeline_mode<synchronous>, transform_indices = @transform_2, window_bounds = array<i64: 32, 16>}, {transform_indices = @transform_3, window_bounds = array<i64: 1, 32, 32>}, {transform_indices = @transform_4, window_bounds = array<i64: 1, 32, 32>}, {transform_indices = @transform_5, window_bounds = array<i64: 1, 32, 32>}, {transform_indices = @transform_6, window_bounds = array<i64: 1, 32, 32>}, {transform_indices = @transform_7, window_bounds = array<i64: 1, 1, 32>}, {transform_indices = @transform_8, window_bounds = array<i64: 1, 1, 32>}, {transform_indices = @transform_9, window_bounds = array<i64: 1, 32, 32>}, {transform_indices = @transform_10, window_bounds = array<i64: 1, 32, 32>}, {transform_indices = @transform_11, window_bounds = array<i64: 1, 1, 32>}, {pipeline_mode = #tpu.pipeline_mode<synchronous>, transform_indices = @transform_12, window_bounds = array<i64: 1, 32>}, {transform_indices = @transform_13, window_bounds = array<i64: 32, 1>}]} {
    %c0_i32 = arith.constant 0 : i32
    %0 = arith.cmpi eq, %arg1, %c0_i32 : i32
    %1 = arith.extui %0 : i1 to i32
    %c0_i32_0 = arith.constant 0 : i32
    %2 = arith.cmpi ne, %1, %c0_i32_0 : i32
    scf.if %2 {
      %c0_58 = arith.constant 0 : index
      %c0_59 = arith.constant 0 : index
      %72 = vector.load %arg2[%c0_58, %c0_59] : memref<32x32xf32, #tpu.memory_space<vmem>>, vector<32x32xf32>
      %c0_60 = arith.constant 0 : index
      %c0_61 = arith.constant 0 : index
      %73 = vector.load %arg16[%c0_60, %c0_61] : memref<32x32xf32, #tpu.memory_space<vmem>>, vector<32x32xf32>
      tpu.vector_store %arg16[%c0_60, %c0_61], %72 {strides = array<i32>} : memref<32x32xf32, #tpu.memory_space<vmem>>, vector<32x32xf32>,
    } else {
    }
    %c0 = arith.constant 0 : index
    %c0_1 = arith.constant 0 : index
    %3 = vector.load %arg16[%c0, %c0_1] : memref<32x32xf32, #tpu.memory_space<vmem>>, vector<32x32xf32>
    %c0_2 = arith.constant 0 : index
    %c0_3 = arith.constant 0 : index
    %c0_4 = arith.constant 0 : index
    %4 = vector.load %arg3[%c0_2, %c0_3, %c0_4] : memref<1x16x32xf32, #tpu.memory_space<vmem>>, vector<1x16x32xf32>
    %5 = vector.shape_cast %4 : vector<1x16x32xf32> to vector<16x32xf32>
    %6 = vector.shape_cast %3 : vector<32x32xf32> to vector<2x16x32xf32>
    %7 = vector.shape_cast %5 : vector<16x32xf32> to vector<1x16x32xf32>
    %8 = vector.broadcast %7 : vector<1x16x32xf32> to vector<2x16x32xf32>
    %9 = arith.addf %6, %8 : vector<2x16x32xf32>
    %10 = vector.shape_cast %9 : vector<2x16x32xf32> to vector<32x32xf32>
    %c0_5 = arith.constant 0 : index
    %c0_6 = arith.constant 0 : index
    %11 = vector.load %arg4[%c0_5, %c0_6] : memref<32x16xf32, #tpu.memory_space<vmem>>, vector<32x16xf32>
    %12 = vector.extract_strided_slice %9 {offsets = [0, 0, 0], sizes = [1, 16, 32], strides = [1, 1, 1]} : vector<2x16x32xf32> to vector<1x16x32xf32>
    %13 = vector.shape_cast %12 : vector<1x16x32xf32> to vector<16x32xf32>
    %cst = arith.constant dense<0.000000e+00> : vector<32x32xf32>
    %14 = tpu.matmul %11, %13, %cst {dimension_numbers = #tpu.dot_dimension_numbers<[1], [0], [0], [1], [0, 0, 1, 1], [], []>, precision = #tpu.contract_precision<fp32>} : vector<32x16xf32>, vector<16x32xf32>, vector<32x32xf32> -> vector<32x32xf32>
    %15 = vector.extract_strided_slice %14 {offsets = [0, 0], sizes = [16, 32], strides = [1, 1]} : vector<32x32xf32> to vector<16x32xf32>
    %c0_7 = arith.constant 0 : index
    %c0_8 = arith.constant 0 : index
    %16 = vector.load %arg17[%c0_7, %c0_8] : memref<32x32xf32, #tpu.memory_space<vmem>>, vector<16x32xf32>
    tpu.vector_store %arg17[%c0_7, %c0_8], %15 {strides = array<i32>} : memref<32x32xf32, #tpu.memory_space<vmem>>, vector<16x32xf32>,
    %17 = vector.extract_strided_slice %14 {offsets = [16, 0], sizes = [16, 32], strides = [1, 1]} : vector<32x32xf32> to vector<16x32xf32>
    %c0_9 = arith.constant 0 : index
    %c0_10 = arith.constant 0 : index
    %18 = vector.load %arg18[%c0_9, %c0_10] : memref<32x32xf32, #tpu.memory_space<vmem>>, vector<16x32xf32>
    tpu.vector_store %arg18[%c0_9, %c0_10], %17 {strides = array<i32>} : memref<32x32xf32, #tpu.memory_space<vmem>>, vector<16x32xf32>,
    %19 = vector.extract_strided_slice %9 {offsets = [1, 0, 0], sizes = [1, 16, 32], strides = [1, 1, 1]} : vector<2x16x32xf32> to vector<1x16x32xf32>
    %20 = vector.shape_cast %19 : vector<1x16x32xf32> to vector<16x32xf32>
    %cst_11 = arith.constant dense<0.000000e+00> : vector<32x32xf32>
    %21 = tpu.matmul %11, %20, %cst_11 {dimension_numbers = #tpu.dot_dimension_numbers<[1], [0], [0], [1], [0, 0, 1, 1], [], []>, precision = #tpu.contract_precision<fp32>} : vector<32x16xf32>, vector<16x32xf32>, vector<32x32xf32> -> vector<32x32xf32>
    %22 = vector.extract_strided_slice %21 {offsets = [0, 0], sizes = [16, 32], strides = [1, 1]} : vector<32x32xf32> to vector<16x32xf32>
    %c16 = arith.constant 16 : index
    %c0_12 = arith.constant 0 : index
    %23 = vector.load %arg17[%c16, %c0_12] : memref<32x32xf32, #tpu.memory_space<vmem>>, vector<16x32xf32>
    tpu.vector_store %arg17[%c16, %c0_12], %22 {strides = array<i32>} : memref<32x32xf32, #tpu.memory_space<vmem>>, vector<16x32xf32>,
    %24 = vector.extract_strided_slice %21 {offsets = [16, 0], sizes = [16, 32], strides = [1, 1]} : vector<32x32xf32> to vector<16x32xf32>
    %c16_13 = arith.constant 16 : index
    %c0_14 = arith.constant 0 : index
    %25 = vector.load %arg18[%c16_13, %c0_14] : memref<32x32xf32, #tpu.memory_space<vmem>>, vector<16x32xf32>
    tpu.vector_store %arg18[%c16_13, %c0_14], %24 {strides = array<i32>} : memref<32x32xf32, #tpu.memory_space<vmem>>, vector<16x32xf32>,
    %c0_15 = arith.constant 0 : index
    %c0_16 = arith.constant 0 : index
    %26 = vector.load %arg17[%c0_15, %c0_16] : memref<32x32xf32, #tpu.memory_space<vmem>>, vector<32x32xf32>
    %c0_17 = arith.constant 0 : index
    %c0_18 = arith.constant 0 : index
    %27 = vector.load %arg18[%c0_17, %c0_18] : memref<32x32xf32, #tpu.memory_space<vmem>>, vector<32x32xf32>
    %c0_19 = arith.constant 0 : index
    %c0_20 = arith.constant 0 : index
    %c0_21 = arith.constant 0 : index
    %28 = vector.load %arg5[%c0_19, %c0_20, %c0_21] : memref<1x32x32xf32, #tpu.memory_space<vmem>>, vector<1x32x32xf32>
    %29 = vector.shape_cast %28 : vector<1x32x32xf32> to vector<32x32xf32>
    %cst_22 = arith.constant dense<0.000000e+00> : vector<32x32xf32>
    %30 = tpu.matmul %10, %29, %cst_22 {dimension_numbers = #tpu.dot_dimension_numbers<[1], [0], [0], [1], [0, 0, 1, 1], [], []>, precision = #tpu.contract_precision<fp32>} : vector<32x32xf32>, vector<32x32xf32>, vector<32x32xf32> -> vector<32x32xf32>
    %c0_23 = arith.constant 0 : index
    %c0_24 = arith.constant 0 : index
    %c0_25 = arith.constant 0 : index
    %31 = vector.load %arg6[%c0_23, %c0_24, %c0_25] : memref<1x32x32xf32, #tpu.memory_space<vmem>>, vector<1x32x32xf32>
    %32 = vector.shape_cast %31 : vector<1x32x32xf32> to vector<32x32xf32>
    %cst_26 = arith.constant dense<0.000000e+00> : vector<32x32xf32>
    %33 = tpu.matmul %26, %32, %cst_26 {dimension_numbers = #tpu.dot_dimension_numbers<[1], [0], [0], [1], [0, 0, 1, 1], [], []>, precision = #tpu.contract_precision<fp32>} : vector<32x32xf32>, vector<32x32xf32>, vector<32x32xf32> -> vector<32x32xf32>
    %34 = arith.addf %30, %33 : vector<32x32xf32>
    %c0_27 = arith.constant 0 : index
    %c0_28 = arith.constant 0 : index
    %c0_29 = arith.constant 0 : index
    %35 = vector.load %arg9[%c0_27, %c0_28, %c0_29] : memref<1x1x32xf32, #tpu.memory_space<vmem>>, vector<1x1x32xf32>
    %36 = vector.shape_cast %35 : vector<1x1x32xf32> to vector<1x32xf32>
    %37 = vector.broadcast %36 : vector<1x32xf32> to vector<32x32xf32>
    %38 = arith.addf %34, %37 : vector<32x32xf32>
    %cst_30 = arith.constant 0.000000e+00 : f32
    %39 = vector.broadcast %cst_30 : f32 to vector<32x32xf32>
    %40 = arith.maximumf %38, %39 : vector<32x32xf32>
    %c0_31 = arith.constant 0 : index
    %c0_32 = arith.constant 0 : index
    %c0_33 = arith.constant 0 : index
    %41 = vector.load %arg7[%c0_31, %c0_32, %c0_33] : memref<1x32x32xf32, #tpu.memory_space<vmem>>, vector<1x32x32xf32>
    %42 = vector.shape_cast %41 : vector<1x32x32xf32> to vector<32x32xf32>
    %cst_34 = arith.constant dense<0.000000e+00> : vector<32x32xf32>
    %43 = tpu.matmul %10, %42, %cst_34 {dimension_numbers = #tpu.dot_dimension_numbers<[1], [0], [0], [1], [0, 0, 1, 1], [], []>, precision = #tpu.contract_precision<fp32>} : vector<32x32xf32>, vector<32x32xf32>, vector<32x32xf32> -> vector<32x32xf32>
    %c0_35 = arith.constant 0 : index
    %c0_36 = arith.constant 0 : index
    %c0_37 = arith.constant 0 : index
    %44 = vector.load %arg8[%c0_35, %c0_36, %c0_37] : memref<1x32x32xf32, #tpu.memory_space<vmem>>, vector<1x32x32xf32>
    %45 = vector.shape_cast %44 : vector<1x32x32xf32> to vector<32x32xf32>
    %cst_38 = arith.constant dense<0.000000e+00> : vector<32x32xf32>
    %46 = tpu.matmul %27, %45, %cst_38 {dimension_numbers = #tpu.dot_dimension_numbers<[1], [0], [0], [1], [0, 0, 1, 1], [], []>, precision = #tpu.contract_precision<fp32>} : vector<32x32xf32>, vector<32x32xf32>, vector<32x32xf32> -> vector<32x32xf32>
    %47 = arith.addf %43, %46 : vector<32x32xf32>
    %c0_39 = arith.constant 0 : index
    %c0_40 = arith.constant 0 : index
    %c0_41 = arith.constant 0 : index
    %48 = vector.load %arg10[%c0_39, %c0_40, %c0_41] : memref<1x1x32xf32, #tpu.memory_space<vmem>>, vector<1x1x32xf32>
    %49 = vector.shape_cast %48 : vector<1x1x32xf32> to vector<1x32xf32>
    %50 = vector.broadcast %49 : vector<1x32xf32> to vector<32x32xf32>
    %51 = arith.addf %47, %50 : vector<32x32xf32>
    %cst_42 = arith.constant 0.000000e+00 : f32
    %52 = vector.broadcast %cst_42 : f32 to vector<32x32xf32>
    %53 = arith.maximumf %51, %52 : vector<32x32xf32>
    %c0_43 = arith.constant 0 : index
    %c0_44 = arith.constant 0 : index
    %c0_45 = arith.constant 0 : index
    %54 = vector.load %arg11[%c0_43, %c0_44, %c0_45] : memref<1x32x32xf32, #tpu.memory_space<vmem>>, vector<1x32x32xf32>
    %55 = vector.shape_cast %54 : vector<1x32x32xf32> to vector<32x32xf32>
    %cst_46 = arith.constant dense<0.000000e+00> : vector<32x32xf32>
    %56 = tpu.matmul %40, %55, %cst_46 {dimension_numbers = #tpu.dot_dimension_numbers<[1], [0], [0], [1], [0, 0, 1, 1], [], []>, precision = #tpu.contract_precision<fp32>} : vector<32x32xf32>, vector<32x32xf32>, vector<32x32xf32> -> vector<32x32xf32>
    %c0_47 = arith.constant 0 : index
    %c0_48 = arith.constant 0 : index
    %c0_49 = arith.constant 0 : index
    %57 = vector.load %arg12[%c0_47, %c0_48, %c0_49] : memref<1x32x32xf32, #tpu.memory_space<vmem>>, vector<1x32x32xf32>
    %58 = vector.shape_cast %57 : vector<1x32x32xf32> to vector<32x32xf32>
    %cst_50 = arith.constant dense<0.000000e+00> : vector<32x32xf32>
    %59 = tpu.matmul %53, %58, %cst_50 {dimension_numbers = #tpu.dot_dimension_numbers<[1], [0], [0], [1], [0, 0, 1, 1], [], []>, precision = #tpu.contract_precision<fp32>} : vector<32x32xf32>, vector<32x32xf32>, vector<32x32xf32> -> vector<32x32xf32>
    %60 = arith.addf %56, %59 : vector<32x32xf32>
    %c0_51 = arith.constant 0 : index
    %c0_52 = arith.constant 0 : index
    %c0_53 = arith.constant 0 : index
    %61 = vector.load %arg13[%c0_51, %c0_52, %c0_53] : memref<1x1x32xf32, #tpu.memory_space<vmem>>, vector<1x1x32xf32>
    %62 = vector.shape_cast %61 : vector<1x1x32xf32> to vector<1x32xf32>
    %63 = vector.broadcast %62 : vector<1x32xf32> to vector<32x32xf32>
    %64 = arith.addf %60, %63 : vector<32x32xf32>
    %c0_i32_54 = arith.constant 0 : i32
    %65 = arith.cmpi sgt, %arg1, %c0_i32_54 : i32
    %66 = arith.addf %64, %3 : vector<32x32xf32>
    %67 = arith.select %65, %66, %64 : vector<32x32xf32>
    %c0_55 = arith.constant 0 : index
    %c0_56 = arith.constant 0 : index
    %68 = vector.load %arg16[%c0_55, %c0_56] : memref<32x32xf32, #tpu.memory_space<vmem>>, vector<32x32xf32>
    tpu.vector_store %arg16[%c0_55, %c0_56], %67 {strides = array<i32>} : memref<32x32xf32, #tpu.memory_space<vmem>>, vector<32x32xf32>,
    %c4_i32 = arith.constant 4 : i32
    %69 = arith.cmpi eq, %arg1, %c4_i32 : i32
    %70 = arith.extui %69 : i1 to i32
    %c0_i32_57 = arith.constant 0 : i32
    %71 = arith.cmpi ne, %70, %c0_i32_57 : i32
    scf.if %71 {
      %c0_58 = arith.constant 0 : index
      %c0_59 = arith.constant 0 : index
      %72 = vector.load %arg14[%c0_58, %c0_59] : memref<1x32xf32, #tpu.memory_space<vmem>>, vector<1x32xf32>
      %73 = vector.broadcast %72 : vector<1x32xf32> to vector<32x32xf32>
      %74 = arith.mulf %67, %73 : vector<32x32xf32>
      %cst_60 = arith.constant dense<0.000000e+00> : vector<32xf32>
      %75 = vector.multi_reduction <add>, %74, %cst_60 [1] : vector<32x32xf32> to vector<32xf32>
      %76 = vector.shape_cast %75 : vector<32xf32> to vector<32x1xf32>
      %c0_61 = arith.constant 0 : index
      %c0_62 = arith.constant 0 : index
      %77 = vector.load %arg15[%c0_61, %c0_62] : memref<32x1xf32, #tpu.memory_space<vmem>>, vector<32x1xf32>
      tpu.vector_store %arg15[%c0_61, %c0_62], %76 {strides = array<i32>} : memref<32x1xf32, #tpu.memory_space<vmem>>, vector<32x1xf32>,
    } else {
    }
    return
  }
  func.func @transform_0(%arg0: i32, %arg1: i32) -> (i32, i32) {
    %c0_i32 = arith.constant 0 : i32
    %c0_i32_0 = arith.constant 0 : i32
    return %arg0, %c0_i32 : i32, i32
  }
  func.func @transform_1(%arg0: i32, %arg1: i32) -> (i32, i32, i32) {
    %c0_i32 = arith.constant 0 : i32
    %c0_i32_0 = arith.constant 0 : i32
    %c0_i32_1 = arith.constant 0 : i32
    return %arg1, %c0_i32, %c0_i32_0 : i32, i32, i32
  }
  func.func @transform_2(%arg0: i32, %arg1: i32) -> (i32, i32) {
    %c0_i32 = arith.constant 0 : i32
    %c0_i32_0 = arith.constant 0 : i32
    %c0_i32_1 = arith.constant 0 : i32
    return %c0_i32, %c0_i32_0 : i32, i32
  }
  func.func @transform_3(%arg0: i32, %arg1: i32) -> (i32, i32, i32) {
    %c0_i32 = arith.constant 0 : i32
    %c0_i32_0 = arith.constant 0 : i32
    %c0_i32_1 = arith.constant 0 : i32
    return %arg1, %c0_i32, %c0_i32_0 : i32, i32, i32
  }
  func.func @transform_4(%arg0: i32, %arg1: i32) -> (i32, i32, i32) {
    %c0_i32 = arith.constant 0 : i32
    %c0_i32_0 = arith.constant 0 : i32
    %c0_i32_1 = arith.constant 0 : i32
    return %arg1, %c0_i32, %c0_i32_0 : i32, i32, i32
  }
  func.func @transform_5(%arg0: i32, %arg1: i32) -> (i32, i32, i32) {
    %c0_i32 = arith.constant 0 : i32
    %c0_i32_0 = arith.constant 0 : i32
    %c0_i32_1 = arith.constant 0 : i32
    return %arg1, %c0_i32, %c0_i32_0 : i32, i32, i32
  }
  func.func @transform_6(%arg0: i32, %arg1: i32) -> (i32, i32, i32) {
    %c0_i32 = arith.constant 0 : i32
    %c0_i32_0 = arith.constant 0 : i32
    %c0_i32_1 = arith.constant 0 : i32
    return %arg1, %c0_i32, %c0_i32_0 : i32, i32, i32
  }
  func.func @transform_7(%arg0: i32, %arg1: i32) -> (i32, i32, i32) {
    %c0_i32 = arith.constant 0 : i32
    %c0_i32_0 = arith.constant 0 : i32
    %c0_i32_1 = arith.constant 0 : i32
    return %arg1, %c0_i32, %c0_i32_0 : i32, i32, i32
  }
  func.func @transform_8(%arg0: i32, %arg1: i32) -> (i32, i32, i32) {
    %c0_i32 = arith.constant 0 : i32
    %c0_i32_0 = arith.constant 0 : i32
    %c0_i32_1 = arith.constant 0 : i32
    return %arg1, %c0_i32, %c0_i32_0 : i32, i32, i32
  }
  func.func @transform_9(%arg0: i32, %arg1: i32) -> (i32, i32, i32) {
    %c0_i32 = arith.constant 0 : i32
    %c0_i32_0 = arith.constant 0 : i32
    %c0_i32_1 = arith.constant 0 : i32
    return %arg1, %c0_i32, %c0_i32_0 : i32, i32, i32
  }
  func.func @transform_10(%arg0: i32, %arg1: i32) -> (i32, i32, i32) {
    %c0_i32 = arith.constant 0 : i32
    %c0_i32_0 = arith.constant 0 : i32
    %c0_i32_1 = arith.constant 0 : i32
    return %arg1, %c0_i32, %c0_i32_0 : i32, i32, i32
  }
  func.func @transform_11(%arg0: i32, %arg1: i32) -> (i32, i32, i32) {
    %c0_i32 = arith.constant 0 : i32
    %c0_i32_0 = arith.constant 0 : i32
    %c0_i32_1 = arith.constant 0 : i32
    return %arg1, %c0_i32, %c0_i32_0 : i32, i32, i32
  }
  func.func @transform_12(%arg0: i32, %arg1: i32) -> (i32, i32) {
    %c0_i32 = arith.constant 0 : i32
    %c0_i32_0 = arith.constant 0 : i32
    %c0_i32_1 = arith.constant 0 : i32
    return %c0_i32, %c0_i32_0 : i32, i32
  }
  func.func @transform_13(%arg0: i32, %arg1: i32) -> (i32, i32) {
    %c0_i32 = arith.constant 0 : i32
    %c0_i32_0 = arith.constant 0 : i32
    return %arg0, %c0_i32 : i32, i32
  }
}

</mosaic_0001>

<bundles_post_ra>
// kernel: message_gnn_decoder_forward.1
= control target key start
LH: loop header
LB: loop body
LE: loop exit
PB: predicated region body
PF: predicated region fallthrough
CT: control target
= control target key end

     0   :  { %s7554_s25 = smov 0   ;;  %s7556_s26 = smov 0   ;;  %s8437_s0 = inlined_call_operand.vmem [shape: f32[32,32], index: 0, kind: input, shape index: {}]   ;;  %s8438_s1 = inlined_call_operand.vmem [shape: f32[5,16,32], index: 1, kind: input, shape index: {}]   ;;  %s8439_s2 = inlined_call_operand.vmem [shape: f32[32,16], index: 2, kind: input, shape index: {}]   ;;  %s8440_s3 = inlined_call_operand.vmem [shape: f32[5,32,32], index: 3, kind: input, shape index: {}]   ;;  %s8441_s4 = inlined_call_operand.vmem [shape: f32[5,32,32], index: 4, kind: input, shape index: {}]   ;;  %s8442_s5 = inlined_call_operand.vmem [shape: f32[5,32,32], index: 5, kind: input, shape index: {}]   ;;  %s8443_s6 = inlined_call_operand.vmem [shape: f32[5,32,32], index: 6, kind: input, shape index: {}]   ;;  %s8444_s7 = inlined_call_operand.vmem [shape: f32[5,1,32], index: 7, kind: input, shape index: {}]   ;;  %s8445_s8 = inlined_call_operand.vmem [shape: f32[5,1,32], index: 8, kind: input, shape index: {}]   ;;  %s8446_s9 = inlined_call_operand.vmem [shape: f32[5,32,32], index: 9, kind: input, shape index: {}]   ;;  %s8447_s10 = inlined_call_operand.vmem [shape: f32[5,32,32], index: 10, kind: input, shape index: {}]   ;;  %s8448_s11 = inlined_call_operand.vmem [shape: f32[5,1,32], index: 11, kind: input, shape index: {}]   ;;  %s8449_s12 = inlined_call_operand.vmem [shape: f32[1,32], index: 12, kind: input, shape index: {}]   ;;  %s8450_s13 = inlined_call_operand.vmem [shape: f32[32,1], index: 13, kind: output, shape index: {}]  }
   0x1   :  { %8454 = sst [smem:[#allocation8_spill]] %s8438_s1  ;;  %s7558_s27 = smov 0  }
   0x2   :  { %8455 = sst [smem:[#allocation9_spill]] %s8440_s3 }
   0x3   :  { %8456 = sst [smem:[#allocation10_spill]] %s8441_s4 }
   0x4   :  { %8457 = sst [smem:[#allocation11_spill]] %s8442_s5 }
   0x5   :  { %8458 = sst [smem:[#allocation12_spill]] %s8443_s6 }
   0x6   :  { %8459 = sst [smem:[#allocation13_spill]] %s8450_s13 }
   0x7 LB: > { %8460 = sst [smem:[#allocation5_spill]] %s7478_s26  ;;  %s32_s28 = sadd.s32 1, %s7478_s26  ;;  %s7482_s27 = sphi %s7558_s27, %s23_s27   ;;  %s7478_s26 = sphi %s7556_s26, %s8473_s26   ;;  %s7474_s25 = sphi %s7554_s25, %s8472_s25  }
   0x8   : > { %8461 = sst [smem:[#allocation6_spill]] %s7482_s27  ;;  %p5908_p0 = scmp.ge.s32.totalorder %s7482_s27, 1 }
   0x9   : > { %p33_p1 = scmp.ge.s32.totalorder %s32_s28, 5  ;;  %p494_p2 = scmp.lt.s32.totalorder %s7482_s27, 6 }
   0xb   : > { %s8475_s28 = smov (%p33_p1, %s32_s28), 0  ;;  %p495_p3 = pnand %p5908_p0, %p494_p2 }
   0xc   : > { %8462 = sst [smem:[#allocation7_spill]] %s8475_s28  ;;  %p588_p4 = scmp.lt.s32.totalorder (!%p495_p3), %s7474_s25, 4 }
   0xd   : > { %498 = sbr.rel (%p495_p3) target bundleno = 1140 (0x474), region = 72  ;;  %s8463_s1 = sld [smem:[#allocation8_spill]] (!%p495_p3) }
   0xe   : > { %s8464_s3 = sld [smem:[#allocation9_spill]] (!%p495_p3)  ;;  %s8465_s4 = sld [smem:[#allocation10_spill]] (!%p495_p3) }
   0xf   : > { %s8466_s5 = sld [smem:[#allocation11_spill]] (!%p495_p3)  ;;  %s8467_s6 = sld [smem:[#allocation12_spill]] (!%p495_p3) }
  0x10   : > { %p5923_p5 = scmp.ne.s32.totalorder (!%p495_p3), %s7474_s25, 0 }
  0x14   : > { %s7576_s29 = scalar_select %p588_p4, %s7474_s25, 4 }
  0x15   : > { %641 = sbr.rel (%p5923_p5) target bundleno = 28 (0x1c), region = 76  ;;  %v642_v0 = vld [vmem:[%s8437_s0] sm:$0xff] (!%p5923_p5)  ;;  %vm646_vm0 = vcmask (!%p5923_p5), 261120   ;;  %v643_v1 = vld [vmem:[%s8437_s0 + $0x8] sm:$0xff] (!%p5923_p5)  ;;  %v644_v2 = vld [vmem:[%s8437_s0 + $0x10] sm:$0xff] (!%p5923_p5) }
  0x16   : > { %s5933_s30 = sshll.u32 %s7576_s29, 4  ;;  %s5934_s14 = sshll.u32 %s7576_s29, 5  ;;  %647 = vst.msk [vmem:[#allocation2] sm:$0xff] (!%p5923_p5), %vm646_vm0, %v642_v0  ;;  %648 = vst.msk [vmem:[#allocation2 + $0x8] sm:$0xff] (!%p5923_p5), %vm646_vm0, %v643_v1  ;;  %v645_v3 = vld [vmem:[%s8437_s0 + $0x18] sm:$0xff] (!%p5923_p5) }
  0x17   : > { %s592_s17 = scalar_lea.vmem %s8463_s1, %s5933_s30  ;;  %s7586_s20 = scalar_lea.vmem %s8464_s3, %s5934_s14  ;;  %649 = vst.msk [vmem:[#allocation2 + $0x10] sm:$0xff] (!%p5923_p5), %vm646_vm0, %v644_v2  ;;  %650 = vst.msk [vmem:[#allocation2 + $0x18] sm:$0xff] (!%p5923_p5), %vm646_vm0, %v645_v3 }
  0x18   : > { %s7591_s23 = scalar_lea.vmem %s8465_s4, %s5934_s14  ;;  %s7596_s26 = scalar_lea.vmem %s8466_s5, %s5934_s14 }
  0x19   : > { %s7601_s15 = scalar_lea.vmem %s8467_s6, %s5934_s14  ;;  %s615_s18 = scalar_lea.vmem %s8444_s7, %s7576_s29 }
  0x1a   : > { %s618_s21 = scalar_lea.vmem %s8445_s8, %s7576_s29  ;;  %s7614_s4 = scalar_lea.vmem %s8446_s9, %s5934_s14 }
  0x1b   : > { %s7619_s5 = scalar_lea.vmem %s8447_s10, %s5934_s14  ;;  %s631_s6 = scalar_lea.vmem %s8448_s11, %s7576_s29 }
  0x1c PF: > { %v7638_v6 = vld [vmem:[%s592_s17] sm:$0xff]  ;;  %vm665_vm1 = vcmask 130048   ;;  %v7640_v7 = vld [vmem:[%s592_s17 + $0x8] sm:$0xff]  ;;  %v663_v14 = vld [vmem:[%s8439_s2 + $0x10] sm:$0xff]  ;;  %vm1266_vm2 = vcmask 261120   ;;  %p5680_p6 = scmp.gt.s32.totalorder %s7474_s25, 0 }
  0x1d   : > { %v651_v4 = vld [vmem:[#allocation2] sm:$0xff]  ;;  %v652_v5 = vld [vmem:[#allocation2 + $0x8] sm:$0xff]  ;;  %v664_v15 = vld [vmem:[%s8439_s2 + $0x18] sm:$0xff]  ;;  %v673_v19 = vsel %vm665_vm1, %v663_v14, 0  ;;  %p5927_p7 = scmp.ne.s32.totalorder %s7474_s25, 4 }
  0x1e   : > { %v7643_v8 = vadd.f32 %v7638_v6, %v651_v4  ;;  %v661_v9 = vld [vmem:[%s8439_s2] sm:$0xff]  ;;  %v662_v10 = vld [vmem:[%s8439_s2 + $0x8] sm:$0xff]  ;;  %v7652_v11 = vadd.f32 %v7640_v7, %v652_v5  ;;  %v7669_v21 = vand.u32 4294901760, %v673_v19  ;;  %v676_v22 = vsel %vm665_vm1, %v664_v15, 0  ;;  %v653_v51 = vld [vmem:[#allocation2 + $0x10] sm:$0xff]  ;;  %s8470_s19 = sld [smem:[#allocation13_spill]] (!%p5927_p7) }
  0x1f   : > { %v667_v12 = vsel %vm665_vm1, %v661_v9, 0  ;;  %v670_v13 = vsel %vm665_vm1, %v662_v10, 0  ;;  %v7679_v26 = vand.u32 4294901760, %v676_v22  ;;  %v654_v52 = vld [vmem:[#allocation2 + $0x18] sm:$0xff]  ;;  %v7714_v53 = vadd.f32 %v7638_v6, %v653_v51  ;;  %v1875_v6 = vld [vmem:[%s7591_s23] sm:$0xff]  ;;  %v1877_v14 = vld [vmem:[%s7591_s23 + $0x10] sm:$0xff] }
  0x20   : > { %v679_v16 = vand.u32 4294901760, %v7643_v8  ;;  %v7663_v17 = vand.u32 4294901760, %v667_v12  ;;  %v7665_v18 = vand.u32 4294901760, %v670_v13  ;;  %v682_v20 = vand.u32 4294901760, %v7652_v11  ;;  %v1878_v15 = vld [vmem:[%s7591_s23 + $0x18] sm:$0xff] }
  0x21   : > { %v7684_v29 = vsub.f32 %v673_v19, %v7669_v21  ;;  %v7693_v33 = vsub.f32 %v676_v22, %v7679_v26  ;;  %v7717_v54 = vadd.f32 %v7640_v7, %v654_v52  ;;  %v1272_v55 = vand.u32 4294901760, %v7714_v53  ;;  %v1876_v7 = vld [vmem:[%s7591_s23 + $0x8] sm:$0xff] }
  0x22   : > { %v7673_v23 = vsub.f32 %v667_v12, %v7663_v17  ;;  %v7676_v24 = vsub.f32 %v670_v13, %v7665_v18  ;;  %v787_v25 = vsub.f32 %v7643_v8, %v679_v16  ;;  %6354 = vmatprep.mubr.f32.mxu0 %v7663_v17  ;;  %v6924_v27 = vpack.c.bf16 %v682_v20, %v679_v16 }
  0x23   : > { %v794_v28 = vsub.f32 %v7652_v11, %v682_v20  ;;  %v7696_v35 = vand.u32 4294901760, %v7684_v29  ;;  %v7703_v39 = vand.u32 4294901760, %v7693_v33  ;;  %v1275_v56 = vand.u32 4294901760, %v7717_v54 }
  0x24   : > { %v7687_v30 = vand.u32 4294901760, %v7673_v23  ;;  %v7690_v31 = vand.u32 4294901760, %v7676_v24  ;;  %v788_v32 = vand.u32 4294901760, %v787_v25  ;;  %6925 = vmatprep.subr.bf16.mxu1 %v6924_v27  ;;  %6945 = vmatprep.subr.bf16.mxu0 %v6924_v27  ;;  %v1380_v58 = vsub.f32 %v7714_v53, %v1272_v55 }
  0x25   : > { %v795_v34 = vand.u32 4294901760, %v794_v28  ;;  %6927 = vmatpush3.bf16.msra.mxu1 %v6924_v27  ;;  %6947 = vmatpush3.bf16.msra.mxu0 %v6924_v27  ;;  %v768_v41 = vsub.f32 %v7684_v29, %v7696_v35  ;;  %v778_v45 = vsub.f32 %v7693_v33, %v7703_v39  ;;  %v6932_v50 = vpack.c.bf16 %v794_v28, %v787_v25 }
  0x26   : > { %v748_v36 = vsub.f32 %v7673_v23, %v7687_v30  ;;  %v758_v37 = vsub.f32 %v7676_v24, %v7690_v31  ;;  %v789_v38 = vsub.f32 %v787_v25, %v788_v32  ;;  %v1387_v59 = vsub.f32 %v7717_v54, %v1275_v56 }
  0x27   : > { %v796_v40 = vsub.f32 %v794_v28, %v795_v34  ;;  %v769_v47 = vand.u32 4294901760, %v768_v41  ;;  %v779_v49 = vand.u32 4294901760, %v778_v45  ;;  %v6940_v57 = vpack.c.bf16 %v795_v34, %v788_v32 }
  0x28   : > { %v749_v42 = vand.u32 4294901760, %v748_v36  ;;  %v759_v43 = vand.u32 4294901760, %v758_v37  ;;  %v790_v44 = vand.u32 4294901760, %v789_v38  ;;  %6355 = vmatmul.mubr.f32.vlgmr.msra.gmra.mrb[0].mxu0 %v7665_v18  ;;  %v1381_v60 = vand.u32 4294901760, %v1380_v58  ;;  %v3150_v38 = vld [vmem:[%s7601_s15] sm:$0xff] }
  0x29   : > { %v797_v46 = vand.u32 4294901760, %v796_v40  ;;  %6357 = vmatprep.mubr.f32.mxu0 %v7669_v21  ;;  %v1388_v61 = vand.u32 4294901760, %v1387_v59  ;;  %v6948_v62 = vpack.c.bf16 %v1275_v56, %v1272_v55  ;;  %v6956_v4 = vpack.c.bf16 %v1387_v59, %v1380_v58 }
  0x2a   : > { %6304 = vmatprep.mubr.f32.mxu1 %v749_v42  ;;  %v1382_v63 = vsub.f32 %v1380_v58, %v1381_v60  ;;  %v1892_v9 = vand.u32 4294901760, %v1875_v6  ;;  %v1895_v10 = vand.u32 4294901760, %v1876_v7  ;;  %v1898_v19 = vand.u32 4294901760, %v1877_v14 }
  0x2b   : > { %6305 = vmatmul.mubr.f32.vlgmr.msra.gmra.mrb[0].mxu1 %v759_v43  ;;  %v6928_v48 = vpack.c.bf16 %v797_v46, %v790_v44  ;;  %v1389_v0 = vsub.f32 %v1387_v59, %v1388_v61  ;;  %v6964_v5 = vpack.c.bf16 %v1388_v61, %v1381_v60  ;;  %v3167_v40 = vand.u32 4294901760, %v3150_v38 }
  0x2c   : > { %6307 = vmatprep.mubr.f32.mxu1 %v769_v47  ;;  %6358 = vmatmul.mubr.f32.gmra.mrb[2].mxu0 %v7679_v26  ;;  %v1383_v1 = vand.u32 4294901760, %v1382_v63  ;;  %v7760_v12 = vsub.f32 %v1875_v6, %v1892_v9  ;;  %v7762_v13 = vsub.f32 %v1876_v7, %v1895_v10  ;;  %v7774_v22 = vsub.f32 %v1877_v14, %v1898_v19 }
  0x2d   : > { %6929 = vmatprep.subr.bf16.mxu1 %v6928_v48  ;;  %v1390_v2 = vand.u32 4294901760, %v1389_v0  ;;  %vm5723_vm4 = vcmask (!%p5927_p7), 7168  }
  0x2e   : > { %6931 = vmatpush3.bf16.msra.mxu1 %v6928_v48  ;;  %v2003_v16 = vand.u32 4294901760, %v7760_v12  ;;  %v6988_v36 = vpack.c.bf16 %v7762_v13, %v7760_v12 }
  0x2f   : > { %6308 = vmatmul.mubr.f32.gmra.mrb[2].mxu1 %v779_v49  ;;  %6933 = vmatprep.subr.bf16.mxu1 %v6932_v50  ;;  %v6952_v3 = vpack.c.bf16 %v1390_v2, %v1383_v1 }
  0x30   : > { %6314 = vmatprep.mubr.f32.mxu1 %v7663_v17  ;;  %v2004_v20 = vsub.f32 %v7760_v12, %v2003_v16 }
  0x33   : > { %6315 = vmatmul.mubr.f32.vlgmr.msra.gmra.mrb[0].mxu1 %v7665_v18 }
  0x34   : > { %6317 = vmatprep.mubr.f32.mxu1 %v7669_v21  ;;  %6935 = vmatpush3.bf16.msra.mxu1 %v6932_v50 }
  0x35   : > { %6937 = vmatprep.subr.bf16.mxu1 %v6924_v27 }
  0x37   : > { %6318 = vmatmul.mubr.f32.gmra.mrb[2].mxu1 %v7679_v26 }
  0x38   : > { %6324 = vmatprep.mubr.f32.mxu1 %v7673_v23 }
  0x3b   : > { %6325 = vmatmul.mubr.f32.vlgmr.msra.gmra.mrb[0].mxu1 %v7676_v24 }
  0x3c   : > { %6327 = vmatprep.mubr.f32.mxu1 %v7684_v29  ;;  %6939 = vmatpush3.bf16.msra.mxu1 %v6924_v27 }
  0x3d   : > { %6941 = vmatprep.subr.bf16.mxu1 %v6940_v57 }
  0x3f   : > { %6328 = vmatmul.mubr.f32.gmra.mrb[2].mxu1 %v7693_v33 }
  0x40   : > { %6334 = vmatprep.mubr.f32.mxu1 %v7687_v30 }
  0x43   : > { %6335 = vmatmul.mubr.f32.vlgmr.msra.gmra.mrb[0].mxu1 %v7690_v31 }
  0x44   : > { %6337 = vmatprep.mubr.f32.mxu1 %v7696_v35  ;;  %6943 = vmatpush3.bf16.msra.mxu1 %v6940_v57 }
  0x45   : > { %6949 = vmatprep.subr.bf16.mxu1 %v6948_v62 }
  0x47   : > { %6338 = vmatmul.mubr.f32.gmra.mrb[2].mxu1 %v7703_v39 }
  0x48   : > { %6344 = vmatprep.mubr.f32.mxu1 %v7663_v17 }
  0x4b   : > { %6345 = vmatmul.mubr.f32.vlgmr.msra.gmra.mrb[0].mxu1 %v7665_v18 }
  0x4c   : > { %6347 = vmatprep.mubr.f32.mxu1 %v7669_v21  ;;  %6951 = vmatpush3.bf16.msra.mxu1 %v6948_v62 }
  0x4d   : > { %6953 = vmatprep.subr.bf16.mxu1 %v6952_v3 }
  0x4f   : > { %6348 = vmatmul.mubr.f32.gmra.mrb[2].mxu1 %v7679_v26 }
  0x50   : > { %6364 = vmatprep.mubr.f32.mxu1 %v749_v42 }
  0x53   : > { %6365 = vmatmul.mubr.f32.vlgmr.msra.gmra.mrb[4].mxu1 %v759_v43  ;;  %v3277_v43 = vsub.f32 %v3150_v38, %v3167_v40 }
  0x54   : > { %6367 = vmatprep.mubr.f32.mxu1 %v769_v47  ;;  %6955 = vmatpush3.bf16.msra.mxu1 %v6952_v3 }
  0x55   : > { %6957 = vmatprep.subr.bf16.mxu1 %v6956_v4  ;;  %v3278_v45 = vand.u32 4294901760, %v3277_v43 }
  0x57   : > { %6368 = vmatmul.mubr.f32.gmra.mrb[6].mxu1 %v779_v49  ;;  %v3279_v47 = vsub.f32 %v3277_v43, %v3278_v45 }
  0x58   : > { %6374 = vmatprep.mubr.f32.mxu1 %v7663_v17 }
  0x59   : > { %v3280_v49 = vand.u32 4294901760, %v3279_v47 }
  0x5b   : > { %6375 = vmatmul.mubr.f32.vlgmr.msra.gmra.mrb[4].mxu1 %v7665_v18 }
  0x5c   : > { %6377 = vmatprep.mubr.f32.mxu1 %v7669_v21  ;;  %6959 = vmatpush3.bf16.msra.mxu1 %v6956_v4 }
  0x5d   : > { %6961 = vmatprep.subr.bf16.mxu1 %v6948_v62 }
  0x5f   : > { %6378 = vmatmul.mubr.f32.gmra.mrb[6].mxu1 %v7679_v26 }
  0x60   : > { %6384 = vmatprep.mubr.f32.mxu1 %v7673_v23 }
  0x63   : > { %6385 = vmatmul.mubr.f32.vlgmr.msra.gmra.mrb[4].mxu1 %v7676_v24  ;;  %v2005_v24 = vand.u32 4294901760, %v2004_v20 }
  0x64   : > { %6387 = vmatprep.mubr.f32.mxu1 %v7684_v29  ;;  %6963 = vmatpush3.bf16.msra.mxu1 %v6948_v62 }
  0x65   : > { %6965 = vmatprep.subr.bf16.mxu1 %v6964_v5 }
  0x67   : > { %6388 = vmatmul.mubr.f32.gmra.mrb[6].mxu1 %v7693_v33 }
  0x68   : > { %6394 = vmatprep.mubr.f32.mxu1 %v7687_v30 }
  0x6b   : > { %6395 = vmatmul.mubr.f32.vlgmr.msra.gmra.mrb[4].mxu1 %v7690_v31  ;;  %v7786_v31 = vpack.c.bf16 %v1895_v10, %v1892_v9 }
  0x6c   : > { %6397 = vmatprep.mubr.f32.mxu1 %v7696_v35  ;;  %6967 = vmatpush3.bf16.msra.mxu1 %v6964_v5 }
  0x6d   : > { %6969 = vmatprep.subr.bf16.mxu1 %v6948_v62 }
  0x6f   : > { %6398 = vmatmul.mubr.f32.gmra.mrb[6].mxu1 %v7703_v39  ;;  %v3151_v39 = vld [vmem:[%s7601_s15 + $0x8] sm:$0xff] }
  0x70   : > { %6404 = vmatprep.mubr.f32.mxu1 %v7663_v17  ;;  %v3170_v41 = vand.u32 4294901760, %v3151_v39 }
  0x72   : > { %v7800_v42 = vpack.c.bf16 %v3170_v41, %v3167_v40  ;;  %v3284_v44 = vsub.f32 %v3151_v39, %v3170_v41 }
  0x73   : > { %6405 = vmatmul.mubr.f32.vlgmr.msra.gmra.mrb[4].mxu1 %v7665_v18 }
  0x74   : > { %6407 = vmatprep.mubr.f32.mxu1 %v7669_v21  ;;  %6971 = vmatpush3.bf16.msra.mxu1 %v6948_v62  ;;  %v3285_v46 = vand.u32 4294901760, %v3284_v44  ;;  %v7805_v52 = vpack.c.bf16 %v3284_v44, %v3277_v43 }
  0x75   : > { %6973 = vmatprep.subr.bf16.mxu1 %v7786_v31 }
  0x76   : > { %v3286_v48 = vsub.f32 %v3284_v44, %v3285_v46  ;;  %v7807_v59 = vpack.c.bf16 %v3285_v46, %v3278_v45 }
  0x77   : > { %6408 = vmatmul.mubr.f32.gmra.mrb[6].mxu1 %v7679_v26 }
  0x78   : > { %6414 = vmatprep.mubr.f32.mxu1 %v7663_v17  ;;  %v2010_v17 = vand.u32 4294901760, %v7762_v13  ;;  %v3287_v50 = vand.u32 4294901760, %v3286_v48 }
  0x7a   : > { %v7803_v51 = vpack.c.bf16 %v3287_v50, %v3280_v49 }
  0x7b   : > { %6415 = vmatmul.mubr.f32.vlgmr.msra.gmra.mrb[4].mxu1 %v7665_v18  ;;  %v1901_v18 = vand.u32 4294901760, %v1878_v15 }
  0x7c   : > { %6417 = vmatprep.mubr.f32.mxu1 %v7669_v21  ;;  %v2011_v21 = vsub.f32 %v7762_v13, %v2010_v17  ;;  %6975 = vmatpush3.bf16.msra.mxu1 %v7786_v31  ;;  %v1871_v13 = vld [vmem:[%s7586_s20] sm:$0xff] }
  0x7d   : > { %v7776_v23 = vsub.f32 %v1878_v15, %v1901_v18  ;;  %v7788_v32 = vpack.c.bf16 %v1901_v18, %v1898_v19  ;;  %v3152_v19 = vld [vmem:[%s7601_s15 + $0x10] sm:$0xff]  ;;  %v3153_v18 = vld [vmem:[%s7601_s15 + $0x18] sm:$0xff] }
  0x7e   : > { %v2012_v25 = vand.u32 4294901760, %v2011_v21 }
  0x7f   : > { %6418 = vmatmul.mubr.f32.gmra.mrb[6].mxu1 %v7679_v26  ;;  %v2017_v26 = vand.u32 4294901760, %v7774_v22  ;;  %v2024_v27 = vand.u32 4294901760, %v7776_v23  ;;  %6977 = vmatprep.subr.bf16.mxu1 %v7788_v32  ;;  %v6992_v37 = vpack.c.bf16 %v7776_v23, %v7774_v22 }
  0x80   : > { %v6980_v28 = vpack.c.bf16 %v2012_v25, %v2005_v24  ;;  %6979 = vmatpush3.bf16.msra.mxu1 %v7788_v32  ;;  %v3173_v25 = vand.u32 4294901760, %v3152_v19 }
  0x81   : > { %v2018_v29 = vsub.f32 %v7774_v22, %v2017_v26  ;;  %v2025_v30 = vsub.f32 %v7776_v23, %v2024_v27  ;;  %7069 = vmatprep.subr.bf16.mxu1 %v7800_v42  ;;  %v1874_v23 = vld [vmem:[%s7586_s20 + $0x18] sm:$0xff] }
  0x82   : > { %6981 = vmatprep.subr.bf16.mxu0 %v6980_v28  ;;  %v7855_v49 = vsub.f32 %v3152_v19, %v3173_v25 }
  0x83   : > { %v2019_v33 = vand.u32 4294901760, %v2018_v29  ;;  %v2026_v34 = vand.u32 4294901760, %v2025_v30  ;;  %6983 = vmatpush3.bf16.msra.mxu0 %v6980_v28  ;;  %v3176_v28 = vand.u32 4294901760, %v3153_v18 }
  0x85   : > { %v6984_v35 = vpack.c.bf16 %v2026_v34, %v2019_v33  ;;  %v7838_v34 = vpack.c.bf16 %v3176_v28, %v3173_v25  ;;  %v7857_v50 = vsub.f32 %v3153_v18, %v3176_v28 }
  0x87   : > { %6985 = vmatprep.subr.bf16.mxu0 %v6984_v35 }
  0x88   : > { %6987 = vmatpush3.bf16.msra.mxu0 %v6984_v35 }
  0x89   : > { %6989 = vmatprep.subr.bf16.mxu0 %v6988_v36 }
  0xfb   : > { %v6356_v55 = vpop.f32.mrb[0].mxu0 }
  0xfc   : > { %v1244_v56 = vpop.f32.mrb[1].mxu0 }
  0xff   : > { %v6359_v57 = vpop.f32.mrb[2].mxu0 }
 0x100   : > { %v1256_v58 = vpop.f32.mrb[3].mxu0 }
 0x11e   : > { %v6346_v60 = vpop.f32.mrb[0].mxu1 }
 0x11f   : > { %v7260_v61 = vadd.f32 %v6356_v55, %v6346_v60  ;;  %v1153_v62 = vpop.f32.mrb[1].mxu1 }
 0x120   : > { %v7261_v63 = vadd.f32 %v1244_v56, %v1153_v62 }
 0x121   : > { %1268 = vst.msk [vmem:[#allocation3 + $0x8] sm:$0xff] %vm1266_vm2, %v7260_v61 }
 0x122   : > { %1267 = vst.msk [vmem:[#allocation3] sm:$0xff] %vm1266_vm2, %v7261_v63  ;;  %v6349_v0 = vpop.f32.mrb[2].mxu1 }
 0x123   : > { %v7262_v1 = vadd.f32 %v6359_v57, %v6349_v0  ;;  %v1165_v2 = vpop.f32.mrb[3].mxu1 }
 0x124   : > { %v7263_v3 = vadd.f32 %v1256_v58, %v1165_v2  ;;  %v3292_v2 = vand.u32 4294901760, %v7855_v49 }
 0x125   : > { %1270 = vst.msk [vmem:[#allocation4 + $0x8] sm:$0xff] %vm1266_vm2, %v7262_v1 }
 0x126   : > { %1269 = vst.msk [vmem:[#allocation4] sm:$0xff] %vm1266_vm2, %v7263_v3  ;;  %v3299_v3 = vand.u32 4294901760, %v7857_v50 }
 0x128   : > { %v1864_v4 = vld [vmem:[#allocation3 + $0x8] sm:$0xff] }
 0x129   : > { %v1863_v5 = vld [vmem:[#allocation3] sm:$0xff]  ;;  %v1883_v6 = vsel %vm1266_vm2, %v1864_v4, 0 }
 0x12a   : > { %v1880_v7 = vsel %vm1266_vm2, %v1863_v5, 0  ;;  %v7815_v9 = vand.u32 4294901760, %v1883_v6 }
 0x12b   : > { %v7817_v10 = vand.u32 4294901760, %v1880_v7 }
 0x12c   : > { %v7820_v14 = vsub.f32 %v1883_v6, %v7815_v9  ;;  %v1868_v38 = vld [vmem:[#allocation4 + $0x8] sm:$0xff] }
 0x12d   : > { %6442 = vmatprep.mubr.f32.mxu0 %v7817_v10  ;;  %v7824_v15 = vsub.f32 %v1880_v7, %v7817_v10  ;;  %v3158_v43 = vsel %vm1266_vm2, %v1868_v38, 0 }
 0x12e   : > { %6443 = vmatmul.mubr.f32.vlgmr.msra.gmra.mrb[4].mxu0 %v7815_v9  ;;  %v1972_v20 = vand.u32 4294901760, %v7820_v14  ;;  %v7852_v46 = vand.u32 4294901760, %v3158_v43 }
 0x12f   : > { %v1962_v21 = vand.u32 4294901760, %v7824_v15  ;;  %6991 = vmatpush3.bf16.msra.mxu0 %v6988_v36  ;;  %v1867_v36 = vld [vmem:[#allocation4] sm:$0xff] }
 0x130   : > { %v1973_v24 = vsub.f32 %v7820_v14, %v1972_v20  ;;  %6993 = vmatprep.subr.bf16.mxu0 %v6992_v37  ;;  %v3155_v39 = vsel %vm1266_vm2, %v1867_v36, 0  ;;  %v7871_v61 = vsub.f32 %v3158_v43, %v7852_v46 }
 0x131   : > { %v1963_v29 = vsub.f32 %v7824_v15, %v1962_v21  ;;  %v7850_v44 = vand.u32 4294901760, %v3155_v39 }
 0x132   : > { %v1974_v33 = vand.u32 4294901760, %v1973_v24  ;;  %v3247_v25 = vand.u32 4294901760, %v7871_v61 }
 0x133   : > { %v1964_v30 = vand.u32 4294901760, %v1963_v29  ;;  %6995 = vmatpush3.bf16.msra.mxu0 %v6992_v37  ;;  %v7863_v57 = vsub.f32 %v3155_v39, %v7850_v44 }
 0x134   : > { %6997 = vmatprep.subr.bf16.mxu0 %v7786_v31 }
 0x135   : > { %6428 = vmatprep.mubr.f32.mxu1 %v1964_v30  ;;  %v3237_v5 = vand.u32 4294901760, %v7863_v57 }
 0x136   : > { %6429 = vmatmul.mubr.f32.vlgmr.msra.gmra.mrb[8].mxu1 %v1974_v33  ;;  %v3293_v33 = vsub.f32 %v7855_v49, %v3292_v2 }
 0x137   : > { %7071 = vmatpush3.bf16.msra.mxu1 %v7800_v42  ;;  %v3238_v36 = vsub.f32 %v7863_v57, %v3237_v5 }
 0x138   : > { %7073 = vmatprep.subr.bf16.mxu1 %v7838_v34 }
 0x13b   : > { %7075 = vmatpush3.bf16.msra.mxu1 %v7838_v34 }
 0x13c   : > { %7077 = vmatprep.subr.bf16.mxu1 %v7803_v51 }
 0x14e   : > { %v6416_v35 = vpop.f32.mrb[4].mxu1 }
 0x14f   : > { %1860 = vst.msk [vmem:[#allocation3 + $0x18] sm:$0xff] %vm1266_vm2, %v6416_v35  ;;  %v1837_v37 = vpop.f32.mrb[5].mxu1  ;;  %v3300_v35 = vsub.f32 %v7857_v50, %v3299_v3 }
 0x150   : > { %1859 = vst.msk [vmem:[#allocation3 + $0x10] sm:$0xff] %vm1266_vm2, %v1837_v37 }
 0x152   : > { %v6419_v40 = vpop.f32.mrb[6].mxu1 }
 0x153   : > { %1862 = vst.msk [vmem:[#allocation4 + $0x18] sm:$0xff] %vm1266_vm2, %v6419_v40  ;;  %v1849_v41 = vpop.f32.mrb[7].mxu1  ;;  %v7004_v40 = vpack.c.bf16 %v2010_v17, %v2003_v16  ;;  %v1872_v16 = vld [vmem:[%s7586_s20 + $0x8] sm:$0xff] }
 0x154   : > { %1861 = vst.msk [vmem:[#allocation4 + $0x10] sm:$0xff] %vm1266_vm2, %v1849_v41  ;;  %v3248_v41 = vsub.f32 %v7871_v61, %v3247_v25 }
 0x156   : > { %v1866_v45 = vld [vmem:[#allocation3 + $0x18] sm:$0xff]  ;;  %v3249_v17 = vand.u32 4294901760, %v3248_v41 }
 0x157   : > { %v1865_v47 = vld [vmem:[#allocation3 + $0x10] sm:$0xff]  ;;  %v1889_v48 = vsel %vm1266_vm2, %v1866_v45, 0  ;;  %v3294_v45 = vand.u32 4294901760, %v3293_v33 }
 0x158   : > { %v1886_v55 = vsel %vm1266_vm2, %v1865_v47, 0  ;;  %v7860_v56 = vand.u32 4294901760, %v1889_v48  ;;  %v3301_v47 = vand.u32 4294901760, %v3300_v35 }
 0x159   : > { %v7865_v58 = vand.u32 4294901760, %v1886_v55 }
 0x15a   : > { %v7868_v60 = vsub.f32 %v1889_v48, %v7860_v56  ;;  %v1870_v62 = vld [vmem:[#allocation4 + $0x18] sm:$0xff]  ;;  %v3239_v48 = vand.u32 4294901760, %v3238_v36 }
 0x15b   : > { %6445 = vmatprep.mubr.f32.mxu0 %v7865_v58  ;;  %v1981_v63 = vsub.f32 %v1886_v55, %v7865_v58  ;;  %v1869_v0 = vld [vmem:[#allocation4 + $0x10] sm:$0xff]  ;;  %v3164_v1 = vsel %vm1266_vm2, %v1870_v62, 0  ;;  %v7080_v62 = vpack.c.bf16 %v3301_v47, %v3294_v45 }
 0x15c   : > { %6446 = vmatmul.mubr.f32.gmra.mrb[6].mxu0 %v7860_v56  ;;  %v1992_v4 = vand.u32 4294901760, %v7868_v60  ;;  %v3161_v6 = vsel %vm1266_vm2, %v1869_v0, 0  ;;  %v7882_v7 = vand.u32 4294901760, %v3164_v1  ;;  %v2521_v0 = vand.u32 4294901760, %v1872_v16 }
 0x15d   : > { %6456 = vmatprep.mubr.f32.mxu0 %v7824_v15  ;;  %v1982_v19 = vand.u32 4294901760, %v1981_v63  ;;  %v7885_v18 = vand.u32 4294901760, %v3161_v6  ;;  %v2506_v15 = vsel %vm1266_vm2, %v7643_v8, 0  ;;  %v2509_v8 = vsel %vm1266_vm2, %v7652_v11, 0 }
 0x15e   : > { %v1993_v24 = vsub.f32 %v7868_v60, %v1992_v4  ;;  %v7890_v28 = vsub.f32 %v3164_v1, %v7882_v7  ;;  %v1873_v1 = vld [vmem:[%s7586_s20 + $0x10] sm:$0xff]  ;;  %v2512_v11 = vsel %vm1266_vm2, %v7714_v53, 0 }
 0x15f   : > { %v1983_v29 = vsub.f32 %v1981_v63, %v1982_v19  ;;  %v7893_v30 = vsub.f32 %v3161_v6, %v7885_v18  ;;  %v7967_v53 = vand.u32 4294901760, %v2512_v11 }
 0x160   : > { %6457 = vmatmul.mubr.f32.vlgmr.msra.gmra.mrb[4].mxu0 %v7820_v14  ;;  %v1994_v39 = vand.u32 4294901760, %v1993_v24  ;;  %v3267_v43 = vand.u32 4294901760, %v7890_v28  ;;  %v7945_v14 = vsub.f32 %v1872_v16, %v2521_v0  ;;  %v7088_v24 = vpack.c.bf16 %v7857_v50, %v7855_v49 }
 0x161   : > { %6459 = vmatprep.mubr.f32.mxu0 %v1981_v63  ;;  %6999 = vmatpush3.bf16.msra.mxu0 %v7786_v31  ;;  %v1984_v37 = vand.u32 4294901760, %v1983_v29  ;;  %v3257_v38 = vand.u32 4294901760, %v7893_v30  ;;  %v2518_v63 = vand.u32 4294901760, %v1871_v13 }
 0x162   : > { %7001 = vmatprep.subr.bf16.mxu0 %v7788_v32  ;;  %v3268_v55 = vsub.f32 %v7890_v28, %v3267_v43  ;;  %v2636_v33 = vand.u32 4294901760, %v7945_v14 }
 0x163   : > { %6431 = vmatprep.mubr.f32.mxu1 %v1984_v37  ;;  %v3258_v12 = vsub.f32 %v7893_v30, %v3257_v38 }
 0x164   : > { %6432 = vmatmul.mubr.f32.gmra.mrb[10].mxu1 %v1994_v39  ;;  %6460 = vmatmul.mubr.f32.gmra.mrb[6].mxu0 %v7868_v60  ;;  %v7008_v60 = vpack.c.bf16 %v2024_v27, %v2017_v26  ;;  %v3269_v22 = vand.u32 4294901760, %v3268_v55  ;;  %v7939_v26 = vand.u32 4294901760, %v2506_v15  ;;  %v7943_v27 = vsub.f32 %v1871_v13, %v2518_v63 }
 0x165   : > { %7003 = vmatpush3.bf16.msra.mxu0 %v7788_v32  ;;  %6470 = vmatprep.mubr.f32.mxu0 %v1962_v21  ;;  %v3259_v21 = vand.u32 4294901760, %v3258_v12  ;;  %v2637_v41 = vsub.f32 %v7945_v14, %v2636_v33 }
 0x166   : > { %6596 = vmatprep.mubr.f32.mxu1 %v3239_v48  ;;  %7005 = vmatprep.subr.bf16.mxu0 %v7004_v40  ;;  %v7950_v6 = vsub.f32 %v2506_v15, %v7939_v26  ;;  %v2629_v29 = vand.u32 4294901760, %v7943_v27  ;;  %v7036_v49 = vpack.c.bf16 %v7945_v14, %v7943_v27 }
 0x168   : > { %6471 = vmatmul.mubr.f32.vlgmr.msra.gmra.mrb[4].mxu0 %v1972_v20  ;;  %6597 = vmatmul.mubr.f32.vlgmr.msra.gmra.mrb[12].mxu1 %v3249_v17  ;;  %v2527_v20 = vand.u32 4294901760, %v1874_v23 }
 0x169   : > { %6473 = vmatprep.mubr.f32.mxu0 %v1982_v19  ;;  %7007 = vmatpush3.bf16.msra.mxu0 %v7004_v40  ;;  %v7952_v19 = vand.u32 4294901760, %v2509_v8  ;;  %v7985_v40 = vpack.c.bf16 %v2521_v0, %v2518_v63 }
 0x16a   : > { %6599 = vmatprep.mubr.f32.mxu1 %v3259_v21  ;;  %7079 = vmatpush3.bf16.msra.mxu1 %v7803_v51  ;;  %v2524_v51 = vand.u32 4294901760, %v1873_v1  ;;  %v7971_v36 = vsub.f32 %v1874_v23, %v2527_v20  ;;  %v3147_v23 = vld [vmem:[%s7596_s26 + $0x8] sm:$0xff] }
 0x16b   : > { %7009 = vmatprep.subr.bf16.mxu0 %v7008_v60  ;;  %7081 = vmatprep.subr.bf16.mxu1 %v7080_v62  ;;  %v7979_v37 = vsub.f32 %v2509_v8, %v7952_v19 }
 0x16c   : > { %6474 = vmatmul.mubr.f32.gmra.mrb[6].mxu0 %v1992_v4  ;;  %6600 = vmatmul.mubr.f32.gmra.mrb[14].mxu1 %v3269_v22  ;;  %v2515_v4 = vsel %vm1266_vm2, %v7717_v54, 0  ;;  %v7969_v35 = vsub.f32 %v1873_v1, %v2524_v51  ;;  %v7976_v54 = vand.u32 4294901760, %v7950_v6  ;;  %v2650_v47 = vand.u32 4294901760, %v7971_v36 }
 0x16d   : > { %7011 = vmatpush3.bf16.msra.mxu0 %v7008_v60  ;;  %6484 = vmatprep.mubr.f32.mxu0 %v7817_v10  ;;  %v7981_v39 = vand.u32 4294901760, %v2515_v4  ;;  %v8006_v12 = vand.u32 4294901760, %v7979_v37 }
 0x16e   : > { %7083 = vmatpush3.bf16.msra.mxu1 %v7080_v62  ;;  %6610 = vmatprep.mubr.f32.mxu1 %v7850_v44  ;;  %v2643_v45 = vand.u32 4294901760, %v7969_v35  ;;  %v2589_v48 = vsub.f32 %v7950_v6, %v7976_v54  ;;  %v2651_v60 = vsub.f32 %v7971_v36, %v2650_v47 }
 0x16f   : > { %7013 = vmatprep.subr.bf16.mxu0 %v7786_v31  ;;  %7085 = vmatprep.subr.bf16.mxu1 %v7805_v52  ;;  %v8009_v13 = vsub.f32 %v2515_v4, %v7981_v39  ;;  %v3148_v4 = vld [vmem:[%s7596_s26 + $0x10] sm:$0xff] }
 0x170   : > { %6485 = vmatmul.mubr.f32.vlgmr.msra.gmra.mrb[4].mxu0 %v7815_v9  ;;  %v2644_v55 = vsub.f32 %v7969_v35, %v2643_v45  ;;  %v8027_v62 = vand.u32 4294901760, %v2589_v48  ;;  %v2652_v0 = vand.u32 4294901760, %v2651_v60  ;;  %v3787_v50 = vand.u32 4294901760, %v3148_v4 }
 0x171   : > { %6611 = vmatmul.mubr.f32.vlgmr.msra.gmra.mrb[12].mxu1 %v7852_v46  ;;  %6487 = vmatprep.mubr.f32.mxu0 %v7865_v58  ;;  %v8032_v15 = vand.u32 4294901760, %v8009_v13 }
 0x172   : > { %7015 = vmatpush3.bf16.msra.mxu0 %v7786_v31  ;;  %6613 = vmatprep.mubr.f32.mxu1 %v7885_v18  ;;  %v2630_v31 = vsub.f32 %v7943_v27, %v2629_v29  ;;  %v2645_v63 = vand.u32 4294901760, %v2644_v55 }
 0x173   : > { %7087 = vmatpush3.bf16.msra.mxu1 %v7805_v52  ;;  %7017 = vmatprep.subr.bf16.mxu0 %v7788_v32  ;;  %v7997_v52 = vsub.f32 %v2512_v11, %v7967_v53  ;;  %v2619_v1 = vsub.f32 %v8009_v13, %v8032_v15  ;;  %v3784_v11 = vand.u32 4294901760, %v3147_v23 }
 0x174   : > { %6488 = vmatmul.mubr.f32.gmra.mrb[6].mxu0 %v7860_v56  ;;  %7089 = vmatprep.subr.bf16.mxu1 %v7088_v24  ;;  %v2631_v16 = vand.u32 4294901760, %v2630_v31 }
 0x175   : > { %6614 = vmatmul.mubr.f32.gmra.mrb[14].mxu1 %v7882_v7  ;;  %6498 = vmatprep.mubr.f32.mxu0 %v7817_v10  ;;  %v8013_v10 = vpack.c.bf16 %v2527_v20, %v2524_v51  ;;  %v8017_v17 = vand.u32 4294901760, %v7997_v52  ;;  %v7032_v51 = vpack.c.bf16 %v2652_v0, %v2645_v63  ;;  %v8058_v20 = vand.u32 4294901760, %v2619_v1 }
 0x176   : > { %7019 = vmatpush3.bf16.msra.mxu0 %v7788_v32  ;;  %6624 = vmatprep.mubr.f32.mxu1 %v7863_v57  ;;  %v2638_v32 = vand.u32 4294901760, %v2637_v41  ;;  %v7104_v57 = vpack.c.bf16 %v3299_v3, %v3292_v2  ;;  %v8077_v3 = vsub.f32 %v3147_v23, %v3784_v11 }
 0x177   : > { %7091 = vmatpush3.bf16.msra.mxu1 %v7088_v24  ;;  %7021 = vmatprep.subr.bf16.mxu0 %v7985_v40  ;;  %v3149_v24 = vld [vmem:[%s7596_s26 + $0x18] sm:$0xff] }
 0x178   : > { %7093 = vmatprep.subr.bf16.mxu1 %v7800_v42  ;;  %v7028_v21 = vpack.c.bf16 %v2638_v32, %v2631_v16 }
 0x179   : > { %6499 = vmatmul.mubr.f32.vlgmr.msra.gmra.mrb[4].mxu0 %v7815_v9  ;;  %v2599_v9 = vsub.f32 %v7979_v37, %v8006_v12 }
 0x17a   : > { %6625 = vmatmul.mubr.f32.vlgmr.msra.gmra.mrb[12].mxu1 %v7871_v61  ;;  %6501 = vmatprep.mubr.f32.mxu0 %v7865_v58  ;;  %v2609_v58 = vsub.f32 %v7997_v52, %v8017_v17  ;;  %v3790_v61 = vand.u32 4294901760, %v3149_v24 }
 0x17b   : > { %7023 = vmatpush3.bf16.msra.mxu0 %v7985_v40  ;;  %6627 = vmatprep.mubr.f32.mxu1 %v7893_v30  ;;  %v8044_v22 = vand.u32 4294901760, %v2599_v9  ;;  %v3899_v30 = vand.u32 4294901760, %v8077_v3 }
 0x17c   : > { %7095 = vmatpush3.bf16.msra.mxu1 %v7800_v42  ;;  %7025 = vmatprep.subr.bf16.mxu0 %v8013_v10  ;;  %v8055_v8 = vand.u32 4294901760, %v2609_v58  ;;  %v8114_v16 = vpack.c.bf16 %v3790_v61, %v3787_v50 }
 0x17d   : > { %6502 = vmatmul.mubr.f32.gmra.mrb[6].mxu0 %v7860_v56  ;;  %7097 = vmatprep.subr.bf16.mxu1 %v7838_v34  ;;  %v3146_v56 = vld [vmem:[%s7596_s26] sm:$0xff]  ;;  %v3900_v41 = vsub.f32 %v8077_v3, %v3899_v30 }
 0x17e   : > { %6628 = vmatmul.mubr.f32.gmra.mrb[14].mxu1 %v7890_v28  ;;  %6512 = vmatprep.mubr.f32.mxu0 %v8027_v62  ;;  %v8089_v28 = vsub.f32 %v3148_v4, %v3787_v50 }
 0x17f   : > { %7027 = vmatpush3.bf16.msra.mxu0 %v8013_v10  ;;  %6638 = vmatprep.mubr.f32.mxu1 %v3237_v5  ;;  %v3781_v5 = vand.u32 4294901760, %v3146_v56  ;;  %v3901_v55 = vand.u32 4294901760, %v3900_v41 }
 0x180   : > { %7099 = vmatpush3.bf16.msra.mxu1 %v7838_v34  ;;  %7029 = vmatprep.subr.bf16.mxu0 %v7028_v21  ;;  %v3906_v48 = vand.u32 4294901760, %v8089_v28 }
 0x181   : > { %7101 = vmatprep.subr.bf16.mxu1 %v7807_v59  ;;  %v8075_v2 = vsub.f32 %v3146_v56, %v3781_v5 }
 0x182   : > { %6513 = vmatmul.mubr.f32.vlgmr.msra.gmra.mrb[4].mxu0 %v8044_v22  ;;  %v3907_v60 = vsub.f32 %v8089_v28, %v3906_v48 }
 0x183   : > { %6639 = vmatmul.mubr.f32.vlgmr.msra.gmra.mrb[12].mxu1 %v3247_v25  ;;  %7031 = vmatpush3.bf16.msra.mxu0 %v7028_v21  ;;  %v3892_v25 = vand.u32 4294901760, %v8075_v2 }
 0x184   : > { %6641 = vmatprep.mubr.f32.mxu1 %v3257_v38  ;;  %7103 = vmatpush3.bf16.msra.mxu1 %v7807_v59  ;;  %v7040_v59 = vpack.c.bf16 %v7971_v36, %v7969_v35  ;;  %v8091_v38 = vsub.f32 %v3149_v24, %v3790_v61  ;;  %v3908_v9 = vand.u32 4294901760, %v3907_v60  ;;  %v4413_v36 = vld [vmem:[%s7619_s5] sm:$0xff] }
 0x185   : > { %6515 = vmatprep.mubr.f32.mxu0 %v8055_v8  ;;  %7033 = vmatprep.subr.bf16.mxu0 %v7032_v51  ;;  %v3893_v31 = vsub.f32 %v8075_v2, %v3892_v25 }
 0x186   : > { %6516 = vmatmul.mubr.f32.gmra.mrb[6].mxu0 %v8058_v20  ;;  %7105 = vmatprep.subr.bf16.mxu1 %v7104_v57  ;;  %v7136_v14 = vpack.c.bf16 %v8091_v38, %v8089_v28 }
 0x187   : > { %6642 = vmatmul.mubr.f32.gmra.mrb[14].mxu1 %v3267_v43  ;;  %7035 = vmatpush3.bf16.msra.mxu0 %v7032_v51  ;;  %v8097_v43 = vpack.c.bf16 %v3784_v11, %v3781_v5  ;;  %v3894_v32 = vand.u32 4294901760, %v3893_v31 }
 0x188   : > { %7107 = vmatpush3.bf16.msra.mxu1 %v7104_v57  ;;  %6652 = vmatprep.mubr.f32.mxu1 %v7850_v44 }
 0x189   : > { %6526 = vmatprep.mubr.f32.mxu0 %v7939_v26  ;;  %7037 = vmatprep.subr.bf16.mxu0 %v7036_v49 }
 0x18a   : > { %6527 = vmatmul.mubr.f32.vlgmr.msra.gmra.mrb[4].mxu0 %v7952_v19  ;;  %7109 = vmatprep.subr.bf16.mxu1 %v7800_v42 }
 0x18b   : > { %6653 = vmatmul.mubr.f32.vlgmr.msra.gmra.mrb[12].mxu1 %v7852_v46  ;;  %7039 = vmatpush3.bf16.msra.mxu0 %v7036_v49 }
 0x18c   : > { %6655 = vmatprep.mubr.f32.mxu1 %v7885_v18  ;;  %7111 = vmatpush3.bf16.msra.mxu1 %v7800_v42  ;;  %v3913_v42 = vand.u32 4294901760, %v8091_v38 }
 0x18d   : > { %6529 = vmatprep.mubr.f32.mxu0 %v7967_v53  ;;  %7041 = vmatprep.subr.bf16.mxu0 %v7040_v59 }
 0x18e   : > { %6530 = vmatmul.mubr.f32.gmra.mrb[6].mxu0 %v7981_v39  ;;  %7113 = vmatprep.subr.bf16.mxu1 %v7838_v34 }
 0x18f   : > { %6656 = vmatmul.mubr.f32.gmra.mrb[14].mxu1 %v7882_v7  ;;  %7043 = vmatpush3.bf16.msra.mxu0 %v7040_v59 }
 0x190   : > { %7115 = vmatpush3.bf16.msra.mxu1 %v7838_v34  ;;  %6666 = vmatprep.mubr.f32.mxu1 %v7850_v44  ;;  %v3914_v34 = vsub.f32 %v8091_v38, %v3913_v42  ;;  %v7052_v44 = vpack.c.bf16 %v2636_v33, %v2629_v29  ;;  %v7148_v29 = vpack.c.bf16 %v3899_v30, %v3892_v25 }
 0x191   : > { %6540 = vmatprep.mubr.f32.mxu0 %v7950_v6  ;;  %7045 = vmatprep.subr.bf16.mxu0 %v7985_v40 }
 0x192   : > { %6541 = vmatmul.mubr.f32.vlgmr.msra.gmra.mrb[4].mxu0 %v7979_v37  ;;  %7117 = vmatprep.subr.bf16.mxu1 %v8097_v43  ;;  %v3915_v21 = vand.u32 4294901760, %v3914_v34 }
 0x193   : > { %6667 = vmatmul.mubr.f32.vlgmr.msra.gmra.mrb[12].mxu1 %v7852_v46  ;;  %7047 = vmatpush3.bf16.msra.mxu0 %v7985_v40  ;;  %v7124_v46 = vpack.c.bf16 %v3901_v55, %v3894_v32 }
 0x194   : > { %6669 = vmatprep.mubr.f32.mxu1 %v7885_v18  ;;  %7119 = vmatpush3.bf16.msra.mxu1 %v8097_v43  ;;  %v7056_v18 = vpack.c.bf16 %v2650_v47, %v2643_v45  ;;  %v7128_v27 = vpack.c.bf16 %v3915_v21, %v3908_v9 }
 0x195   : > { %6543 = vmatprep.mubr.f32.mxu0 %v7997_v52  ;;  %7049 = vmatprep.subr.bf16.mxu0 %v8013_v10 }
 0x196   : > { %6544 = vmatmul.mubr.f32.gmra.mrb[6].mxu0 %v8009_v13  ;;  %7121 = vmatprep.subr.bf16.mxu1 %v8114_v16 }
 0x197   : > { %6670 = vmatmul.mubr.f32.gmra.mrb[14].mxu1 %v7882_v7  ;;  %7051 = vmatpush3.bf16.msra.mxu0 %v8013_v10  ;;  %v7132_v7 = vpack.c.bf16 %v8077_v3, %v8075_v2 }
 0x198   : > { %7123 = vmatpush3.bf16.msra.mxu1 %v8114_v16  ;;  %6554 = vmatprep.mubr.f32.mxu0 %v7976_v54 }
 0x199   : > { %6680 = vmatprep.mubr.f32.mxu1 %v8027_v62  ;;  %7053 = vmatprep.subr.bf16.mxu0 %v7052_v44 }
 0x19a   : > { %6555 = vmatmul.mubr.f32.vlgmr.msra.gmra.mrb[4].mxu0 %v8006_v12  ;;  %7125 = vmatprep.subr.bf16.mxu1 %v7124_v46 }
 0x19b   : > { %6681 = vmatmul.mubr.f32.vlgmr.msra.gmra.mrb[12].mxu1 %v8044_v22  ;;  %7055 = vmatpush3.bf16.msra.mxu0 %v7052_v44 }
 0x19c   : > { %7127 = vmatpush3.bf16.msra.mxu1 %v7124_v46  ;;  %6557 = vmatprep.mubr.f32.mxu0 %v8017_v17 }
 0x19d   : > { %6683 = vmatprep.mubr.f32.mxu1 %v8055_v8  ;;  %7057 = vmatprep.subr.bf16.mxu0 %v7056_v18 }
 0x19e   : > { %6558 = vmatmul.mubr.f32.gmra.mrb[6].mxu0 %v8032_v15  ;;  %7129 = vmatprep.subr.bf16.mxu1 %v7128_v27 }
 0x19f   : > { %6684 = vmatmul.mubr.f32.gmra.mrb[14].mxu1 %v8058_v20  ;;  %7059 = vmatpush3.bf16.msra.mxu0 %v7056_v18 }
 0x1a0   : > { %7131 = vmatpush3.bf16.msra.mxu1 %v7128_v27  ;;  %6568 = vmatprep.mubr.f32.mxu0 %v7939_v26 }
 0x1a1   : > { %6694 = vmatprep.mubr.f32.mxu1 %v7939_v26  ;;  %7061 = vmatprep.subr.bf16.mxu0 %v7985_v40 }
 0x1a2   : > { %6569 = vmatmul.mubr.f32.vlgmr.msra.gmra.mrb[4].mxu0 %v7952_v19  ;;  %7133 = vmatprep.subr.bf16.mxu1 %v7132_v7 }
 0x1a3   : > { %6695 = vmatmul.mubr.f32.vlgmr.msra.gmra.mrb[12].mxu1 %v7952_v19  ;;  %7063 = vmatpush3.bf16.msra.mxu0 %v7985_v40 }
 0x1a4   : > { %7135 = vmatpush3.bf16.msra.mxu1 %v7132_v7  ;;  %6571 = vmatprep.mubr.f32.mxu0 %v7967_v53 }
 0x1a5   : > { %6697 = vmatprep.mubr.f32.mxu1 %v7967_v53  ;;  %7065 = vmatprep.subr.bf16.mxu0 %v8013_v10 }
 0x1a6   : > { %6572 = vmatmul.mubr.f32.gmra.mrb[6].mxu0 %v7981_v39  ;;  %7137 = vmatprep.subr.bf16.mxu1 %v7136_v14 }
 0x1a7   : > { %6698 = vmatmul.mubr.f32.gmra.mrb[14].mxu1 %v7981_v39  ;;  %7067 = vmatpush3.bf16.msra.mxu0 %v8013_v10 }
 0x1a8   : > { %7139 = vmatpush3.bf16.msra.mxu1 %v7136_v14  ;;  %6582 = vmatprep.mubr.f32.mxu0 %v7939_v26 }
 0x1a9   : > { %6708 = vmatprep.mubr.f32.mxu1 %v7950_v6  ;;  %7141 = vmatprep.subr.bf16.mxu1 %v8097_v43  ;;  %v7152_v6 = vpack.c.bf16 %v3913_v42, %v3906_v48 }
 0x1aa   : > { %6583 = vmatmul.mubr.f32.vlgmr.msra.gmra.mrb[4].mxu0 %v7952_v19 }
 0x1ab   : > { %6709 = vmatmul.mubr.f32.vlgmr.msra.gmra.mrb[12].mxu1 %v7979_v37  ;;  %6585 = vmatprep.mubr.f32.mxu0 %v7967_v53  ;;  %v4430_v37 = vand.u32 4294901760, %v4413_v36 }
 0x1ac   : > { %7143 = vmatpush3.bf16.msra.mxu1 %v8097_v43  ;;  %6711 = vmatprep.mubr.f32.mxu1 %v7997_v52 }
 0x1ad   : > { %7145 = vmatprep.subr.bf16.mxu1 %v8114_v16  ;;  %v4540_v45 = vsub.f32 %v4413_v36, %v4430_v37 }
 0x1ae   : > { %6586 = vmatmul.mubr.f32.gmra.mrb[6].mxu0 %v7981_v39 }
 0x1af   : > { %6712 = vmatmul.mubr.f32.gmra.mrb[14].mxu1 %v8009_v13  ;;  %v4416_v13 = vld [vmem:[%s7619_s5 + $0x18] sm:$0xff]  ;;  %v4541_v10 = vand.u32 4294901760, %v4540_v45 }
 0x1b0   : > { %7147 = vmatpush3.bf16.msra.mxu1 %v8114_v16  ;;  %6722 = vmatprep.mubr.f32.mxu1 %v7976_v54  ;;  %v4414_v54 = vld [vmem:[%s7619_s5 + $0x8] sm:$0xff] }
 0x1b1   : > { %7149 = vmatprep.subr.bf16.mxu1 %v7148_v29  ;;  %v4433_v40 = vand.u32 4294901760, %v4414_v54 }
 0x1b3   : > { %6723 = vmatmul.mubr.f32.vlgmr.msra.gmra.mrb[12].mxu1 %v8006_v12  ;;  %v8205_v52 = vpack.c.bf16 %v4433_v40, %v4430_v37  ;;  %v4547_v47 = vsub.f32 %v4414_v54, %v4433_v40  ;;  %v4415_v12 = vld [vmem:[%s7619_s5 + $0x10] sm:$0xff] }
 0x1b4   : > { %7151 = vmatpush3.bf16.msra.mxu1 %v7148_v29  ;;  %6725 = vmatprep.mubr.f32.mxu1 %v8017_v17  ;;  %v4542_v17 = vsub.f32 %v4540_v45, %v4541_v10 }
 0x1b5   : > { %7153 = vmatprep.subr.bf16.mxu1 %v7152_v6  ;;  %7165 = vmatprep.subr.bf16.mxu0 %v8205_v52  ;;  %v7180_v5 = vpack.c.bf16 %v4547_v47, %v4540_v45 }
 0x1b6   : > { %7167 = vmatpush3.bf16.msra.mxu0 %v8205_v52  ;;  %v4543_v63 = vand.u32 4294901760, %v4542_v17 }
 0x1b7   : > { %6726 = vmatmul.mubr.f32.gmra.mrb[14].mxu1 %v8032_v15 }
 0x1b8   : > { %7155 = vmatpush3.bf16.msra.mxu1 %v7152_v6  ;;  %6736 = vmatprep.mubr.f32.mxu1 %v7939_v26 }
 0x1b9   : > { %7157 = vmatprep.subr.bf16.mxu1 %v8097_v43 }
 0x1bb   : > { %6737 = vmatmul.mubr.f32.vlgmr.msra.gmra.mrb[12].mxu1 %v7952_v19 }
 0x1bc   : > { %7159 = vmatpush3.bf16.msra.mxu1 %v8097_v43  ;;  %6739 = vmatprep.mubr.f32.mxu1 %v7967_v53  ;;  %v5925_v43 = vld [vmem:[%s618_s21] ss:$0 sm:$0xff] }
 0x1bd   : > { %7161 = vmatprep.subr.bf16.mxu1 %v8114_v16 }
 0x1bf   : > { %6740 = vmatmul.mubr.f32.gmra.mrb[14].mxu1 %v7981_v39 }
 0x1c0   : > { %7163 = vmatpush3.bf16.msra.mxu1 %v8114_v16  ;;  %6750 = vmatprep.mubr.f32.mxu1 %v7939_v26  ;;  %v4436_v26 = vand.u32 4294901760, %v4415_v12 }
 0x1c2   : > { %v4554_v15 = vsub.f32 %v4415_v12, %v4436_v26 }
 0x1c3   : > { %6751 = vmatmul.mubr.f32.vlgmr.msra.gmra.mrb[12].mxu1 %v7952_v19  ;;  %v4439_v19 = vand.u32 4294901760, %v4416_v13 }
 0x1c4   : > { %6753 = vmatprep.mubr.f32.mxu1 %v7967_v53  ;;  %v4548_v53 = vand.u32 4294901760, %v4547_v47  ;;  %v4555_v22 = vand.u32 4294901760, %v4554_v15 }
 0x1c5   : > { %v4561_v58 = vsub.f32 %v4416_v13, %v4439_v19 }
 0x1c6   : > { %v4549_v62 = vsub.f32 %v4547_v47, %v4548_v53  ;;  %v4556_v23 = vsub.f32 %v4554_v15, %v4555_v22  ;;  %v8217_v49 = vpack.c.bf16 %v4548_v53, %v4541_v10 }
 0x1c7   : > { %6754 = vmatmul.mubr.f32.gmra.mrb[14].mxu1 %v7981_v39  ;;  %v8211_v39 = vpack.c.bf16 %v4439_v19, %v4436_v26  ;;  %v4562_v1 = vand.u32 4294901760, %v4561_v58  ;;  %v8215_v11 = vpack.c.bf16 %v4561_v58, %v4554_v15 }
 0x1c8   : > { %v4550_v0 = vand.u32 4294901760, %v4549_v62  ;;  %v4557_v51 = vand.u32 4294901760, %v4556_v23 }
 0x1c9   : > { %7169 = vmatprep.subr.bf16.mxu0 %v8211_v39  ;;  %v4563_v8 = vsub.f32 %v4561_v58, %v4562_v1  ;;  %v8219_v50 = vpack.c.bf16 %v4562_v1, %v4555_v22  ;;  %v5924_v58 = vld [vmem:[%s615_s18] ss:$0 sm:$0xff]  ;;  %v4410_v22 = vld [vmem:[%s7614_s4 + $0x8] sm:$0xff] }
 0x1ca   : > { %7171 = vmatpush3.bf16.msra.mxu0 %v8211_v39  ;;  %v7172_v56 = vpack.c.bf16 %v4550_v0, %v4543_v63  ;;  %v4409_v0 = vld [vmem:[%s7614_s4] sm:$0xff] }
 0x1cb   : > { %v4564_v20 = vand.u32 4294901760, %v4563_v8  ;;  %v5056_v8 = vand.u32 4294901760, %v4409_v0 }
 0x1cc   : > { %7173 = vmatprep.subr.bf16.mxu0 %v7172_v56 }
 0x1cd   : > { %v7176_v57 = vpack.c.bf16 %v4564_v20, %v4557_v51  ;;  %v5059_v51 = vand.u32 4294901760, %v4410_v22 }
 0x209   : > { %v6430_v33 = vpop.f32.mrb[8].mxu1 }
 0x20a   : > { %v1966_v35 = vpop.f32.mrb[9].mxu1 }
 0x237   : > { %v6433_v4 = vpop.f32.mrb[10].mxu1 }
 0x238   : > { %v1986_v24 = vpop.f32.mrb[11].mxu1 }
 0x27d   : > { %v6584_v61 = vpop.f32.mrb[4].mxu0 }
 0x27e   : > { %v8221_v2 = vadd.f32 %v6584_v61, %v6430_v33  ;;  %v3109_v3 = vpop.f32.mrb[5].mxu0  ;;  %v8278_v61 = vsub.f32 %v4409_v0, %v5056_v8 }
 0x27f   : > { %v7265_v59 = vadd.f32 %v3109_v3, %v1966_v35 }
 0x280   : > { %v3139_v1 = vadd.f32 %v8221_v2, %v5924_v58  ;;  %v8280_v2 = vsub.f32 %v4410_v22, %v5059_v51 }
 0x281   : > { %v6587_v25 = vpop.f32.mrb[6].mxu0  ;;  %v3138_v63 = vadd.f32 %v7265_v59, %v5924_v58 }
 0x282   : > { %v8223_v30 = vadd.f32 %v6587_v25, %v6433_v4  ;;  %v3121_v28 = vpop.f32.mrb[7].mxu0  ;;  %v3143_v20 = vmax.f32 %v3139_v1, 0.0 }
 0x283   : > { %v8225_v38 = vadd.f32 %v3121_v28, %v1986_v24 }
 0x284   : > { %v5047_v25 = vsel %vm1266_vm2, %v3143_v20, 0 }
 0x285   : > { %v3140_v23 = vadd.f32 %v8225_v38, %v5924_v58 }
 0x287   : > { %v3144_v24 = vmax.f32 %v3140_v23, 0.0 }
 0x289   : > { %v5050_v38 = vsel %vm1266_vm2, %v3144_v24, 0 }
 0x296   : > { %v6752_v31 = vpop.f32.mrb[12].mxu1 }
 0x297   : > { %v4402_v41 = vadd.f32 %v6752_v31, %v5925_v43  ;;  %v4372_v48 = vpop.f32.mrb[13].mxu1  ;;  %v8291_v31 = vand.u32 4294901760, %v5047_v25 }
 0x298   : > { %v4401_v42 = vadd.f32 %v5925_v43, %v4372_v48 }
 0x299   : > { %v4406_v16 = vmax.f32 %v4402_v41, 0.0 }
 0x29a   : > { %v4405_v32 = vmax.f32 %v4401_v42, 0.0  ;;  %v6755_v55 = vpop.f32.mrb[14].mxu1 }
 0x29b   : > { %v4421_v60 = vsel %vm1266_vm2, %v4406_v16, 0  ;;  %v4404_v34 = vadd.f32 %v6755_v55, %v5925_v43  ;;  %v4384_v44 = vpop.f32.mrb[15].mxu1 }
 0x29c   : > { %v8233_v46 = vand.u32 4294901760, %v4421_v60  ;;  %v4418_v9 = vsel %vm1266_vm2, %v4405_v32, 0  ;;  %v4403_v21 = vadd.f32 %v5925_v43, %v4384_v44  ;;  %v5174_v43 = vand.u32 4294901760, %v8280_v2 }
 0x29d   : > { %v8236_v18 = vand.u32 4294901760, %v4418_v9  ;;  %v4408_v27 = vmax.f32 %v4404_v34, 0.0  ;;  %v8307_v32 = vpack.c.bf16 %v5059_v51, %v5056_v8  ;;  %v8316_v34 = vsub.f32 %v5047_v25, %v8291_v31  ;;  %v7456_v51 = vld [vmem:[#allocation2 + $0x8] sm:$0xff] }
 0x29e   : > { %v4509_v7 = vsub.f32 %v4421_v60, %v8233_v46  ;;  %v4407_v14 = vmax.f32 %v4403_v21, 0.0  ;;  %v5175_v60 = vsub.f32 %v8280_v2, %v5174_v43 }
 0x29f   : > { %v4499_v29 = vsub.f32 %v4418_v9, %v8236_v18  ;;  %v4427_v6 = vsel %vm1266_vm2, %v4408_v27, 0 }
 0x2a0   : > { %v4510_v33 = vand.u32 4294901760, %v4509_v7  ;;  %v8241_v35 = vand.u32 4294901760, %v4427_v6  ;;  %v4424_v36 = vsel %vm1266_vm2, %v4407_v14, 0 }
 0x2a1   : > { %v8244_v54 = vand.u32 4294901760, %v4424_v36  ;;  %v4500_v37 = vand.u32 4294901760, %v4499_v29 }
 0x2a2   : > { %v4511_v40 = vsub.f32 %v4509_v7, %v4510_v33  ;;  %v8247_v45 = vsub.f32 %v4427_v6, %v8241_v35  ;;  %v5136_v6 = vand.u32 4294901760, %v8316_v34 }
 0x2a3   : > { %v4519_v47 = vsub.f32 %v4424_v36, %v8244_v54  ;;  %v4501_v12 = vsub.f32 %v4499_v29, %v4500_v37 }
 0x2a4   : > { %v4530_v13 = vand.u32 4294901760, %v8247_v45  ;;  %v4512_v10 = vand.u32 4294901760, %v4511_v40 }
 0x2a5   : > { %v4502_v26 = vand.u32 4294901760, %v4501_v12  ;;  %v4520_v19 = vand.u32 4294901760, %v4519_v47 }
 0x2a6   : > { %v4531_v53 = vsub.f32 %v8247_v45, %v4530_v13 }
 0x2a7   : > { %6764 = vmatprep.mubr.f32.mxu0 %v4502_v26  ;;  %v4521_v17 = vsub.f32 %v4519_v47, %v4520_v19 }
 0x2a8   : > { %6765 = vmatmul.mubr.f32.vlgmr.msra.gmra.mrb[8].mxu0 %v4512_v10  ;;  %v4532_v15 = vand.u32 4294901760, %v4531_v53 }
 0x2a9   : > { %7175 = vmatpush3.bf16.msra.mxu0 %v7172_v56  ;;  %v4522_v62 = vand.u32 4294901760, %v4521_v17  ;;  %v3142_v56 = vmax.f32 %v3138_v63, 0.0  ;;  %v5926_v63 = vld [vmem:[%s631_s6] ss:$0 sm:$0xff] }
 0x2aa   : > { %7177 = vmatprep.subr.bf16.mxu0 %v7176_v57 }
 0x2ab   : > { %6767 = vmatprep.mubr.f32.mxu0 %v4522_v62  ;;  %v5044_v4 = vsel %vm1266_vm2, %v3142_v56, 0  ;;  %v7228_v62 = vpack.c.bf16 %v8280_v2, %v8278_v61 }
 0x2ac   : > { %6768 = vmatmul.mubr.f32.gmra.mrb[10].mxu0 %v4532_v15 }
 0x2ad   : > { %7179 = vmatpush3.bf16.msra.mxu0 %v7176_v57  ;;  %6778 = vmatprep.mubr.f32.mxu0 %v8236_v18  ;;  %v3141_v57 = vadd.f32 %v8223_v30, %v5924_v58  ;;  %v8284_v30 = vand.u32 4294901760, %v5044_v4 }
 0x2ae   : > { %7181 = vmatprep.subr.bf16.mxu0 %v7180_v5 }
 0x2af   : > { %v3145_v28 = vmax.f32 %v3141_v57, 0.0  ;;  %v8299_v42 = vsub.f32 %v5044_v4, %v8284_v30  ;;  %v7457_v57 = vld [vmem:[#allocation2] sm:$0xff] }
 0x2b0   : > { %6779 = vmatmul.mubr.f32.vlgmr.msra.gmra.mrb[8].mxu0 %v8233_v46 }
 0x2b1   : > { %6781 = vmatprep.mubr.f32.mxu0 %v8244_v54  ;;  %7183 = vmatpush3.bf16.msra.mxu0 %v7180_v5  ;;  %v4411_v5 = vld [vmem:[%s7614_s4 + $0x10] sm:$0xff]  ;;  %v5053_v16 = vsel %vm1266_vm2, %v3145_v28, 0  ;;  %v5126_v27 = vand.u32 4294901760, %v8299_v42 }
 0x2b2   : > { %7185 = vmatprep.subr.bf16.mxu0 %v8215_v11  ;;  %v5062_v3 = vand.u32 4294901760, %v4411_v5  ;;  %v8318_v44 = vand.u32 4294901760, %v5053_v16 }
 0x2b4   : > { %6782 = vmatmul.mubr.f32.gmra.mrb[10].mxu0 %v8241_v35  ;;  %v8294_v41 = vsub.f32 %v4411_v5, %v5062_v3 }
 0x2b5   : > { %7187 = vmatpush3.bf16.msra.mxu0 %v8215_v11  ;;  %6792 = vmatprep.mubr.f32.mxu0 %v4499_v29  ;;  %v4412_v11 = vld [vmem:[%s7614_s4 + $0x18] sm:$0xff]  ;;  %v5176_v29 = vand.u32 4294901760, %v5175_v60  ;;  %s5685_s4 = scalar_select %p5680_p6, 1, 0 }
 0x2b6   : > { %7189 = vmatprep.subr.bf16.mxu0 %v8205_v52  ;;  %v5065_v59 = vand.u32 4294901760, %v4412_v11  ;;  %v5181_v9 = vand.u32 4294901760, %v8294_v41 }
 0x2b7   : > { %v5686_v0 = vstv %s5685_s4 }
 0x2b8   : > { %6793 = vmatmul.mubr.f32.vlgmr.msra.gmra.mrb[8].mxu0 %v4509_v7  ;;  %v8296_v48 = vsub.f32 %v4412_v11, %v5065_v59  ;;  %v8330_v7 = vpack.c.bf16 %v5065_v59, %v5062_v3  ;;  %v5182_v36 = vsub.f32 %v8294_v41, %v5181_v9  ;;  %vm8392_vm3 = vcmp.eq.s32.totalorder %v5686_v0, 1  ;;  %v7458_v59 = vld [vmem:[#allocation2 + $0x18] sm:$0xff] }
 0x2b9   : > { %6795 = vmatprep.mubr.f32.mxu0 %v4519_v47  ;;  %7191 = vmatpush3.bf16.msra.mxu0 %v8205_v52 }
 0x2ba   : > { %7193 = vmatprep.subr.bf16.mxu0 %v8211_v39  ;;  %v5183_v12 = vand.u32 4294901760, %v5182_v36 }
 0x2bc   : > { %6796 = vmatmul.mubr.f32.gmra.mrb[10].mxu0 %v8247_v45  ;;  %v5137_v45 = vsub.f32 %v8316_v34, %v5136_v6 }
 0x2bd   : > { %7195 = vmatpush3.bf16.msra.mxu0 %v8211_v39  ;;  %6806 = vmatprep.mubr.f32.mxu0 %v4500_v37 }
 0x2be   : > { %7197 = vmatprep.subr.bf16.mxu0 %v8217_v49 }
 0x2c0   : > { %6807 = vmatmul.mubr.f32.vlgmr.msra.gmra.mrb[8].mxu0 %v4510_v33  ;;  %v5155_v33 = vsub.f32 %v5053_v16, %v8318_v44 }
 0x2c1   : > { %6809 = vmatprep.mubr.f32.mxu0 %v4520_v19  ;;  %7199 = vmatpush3.bf16.msra.mxu0 %v8217_v49  ;;  %v5167_v49 = vand.u32 4294901760, %v8278_v61 }
 0x2c2   : > { %7201 = vmatprep.subr.bf16.mxu0 %v8219_v50  ;;  %v5156_v47 = vand.u32 4294901760, %v5155_v33 }
 0x2c3   : > { %v5168_v55 = vsub.f32 %v8278_v61, %v5167_v49  ;;  %v7244_v15 = vpack.c.bf16 %v5174_v43, %v5167_v49  ;;  %v5928_v43 = vld [vmem:[%s8449_s12] ss:$0 sm:$0xff] (!%p5927_p7) }
 0x2c4   : > { %6810 = vmatmul.mubr.f32.gmra.mrb[10].mxu0 %v4530_v13 }
 0x2c5   : > { %7203 = vmatpush3.bf16.msra.mxu0 %v8219_v50  ;;  %6820 = vmatprep.mubr.f32.mxu0 %v8236_v18  ;;  %v8302_v50 = vand.u32 4294901760, %v5050_v38  ;;  %v5169_v14 = vand.u32 4294901760, %v5168_v55 }
 0x2c6   : > { %7205 = vmatprep.subr.bf16.mxu0 %v8205_v52 }
 0x2c7   : > { %v8324_v21 = vsub.f32 %v5050_v38, %v8302_v50  ;;  %v7220_v40 = vpack.c.bf16 %v5176_v29, %v5169_v14 }
 0x2c8   : > { %6821 = vmatmul.mubr.f32.vlgmr.msra.gmra.mrb[8].mxu0 %v8233_v46 }
 0x2c9   : > { %6823 = vmatprep.mubr.f32.mxu0 %v8244_v54  ;;  %7207 = vmatpush3.bf16.msra.mxu0 %v8205_v52  ;;  %v5188_v52 = vand.u32 4294901760, %v8296_v48  ;;  %v5146_v37 = vand.u32 4294901760, %v8324_v21 }
 0x2ca   : > { %7209 = vmatprep.subr.bf16.mxu0 %v8211_v39 }
 0x2cb   : > { %v5147_v19 = vsub.f32 %v8324_v21, %v5146_v37  ;;  %v7248_v58 = vpack.c.bf16 %v5188_v52, %v5181_v9 }
 0x2cc   : > { %6824 = vmatmul.mubr.f32.gmra.mrb[10].mxu0 %v8241_v35 }
 0x2cd   : > { %7211 = vmatpush3.bf16.msra.mxu0 %v8211_v39  ;;  %6834 = vmatprep.mubr.f32.mxu0 %v8236_v18  ;;  %v5189_v39 = vsub.f32 %v8296_v48, %v5188_v52  ;;  %v5127_v18 = vsub.f32 %v8299_v42, %v5126_v27  ;;  %v5148_v53 = vand.u32 4294901760, %v5147_v19 }
 0x2ce   : > { %7213 = vmatprep.subr.bf16.mxu0 %v8307_v32 }
 0x2cf   : > { %v5190_v13 = vand.u32 4294901760, %v5189_v39  ;;  %v5128_v26 = vand.u32 4294901760, %v5127_v18 }
 0x2d0   : > { %6835 = vmatmul.mubr.f32.vlgmr.msra.gmra.mrb[8].mxu0 %v8233_v46  ;;  %v5138_v46 = vand.u32 4294901760, %v5137_v45 }
 0x2d1   : > { %6837 = vmatprep.mubr.f32.mxu0 %v8244_v54  ;;  %7215 = vmatpush3.bf16.msra.mxu0 %v8307_v32  ;;  %v5157_v54 = vsub.f32 %v5155_v33, %v5156_v47  ;;  %v7224_v10 = vpack.c.bf16 %v5190_v13, %v5183_v12 }
 0x2d2   : > { %7217 = vmatprep.subr.bf16.mxu0 %v8330_v7 }
 0x2d3   : > { %v5158_v17 = vand.u32 4294901760, %v5157_v54 }
 0x2d4   : > { %6838 = vmatmul.mubr.f32.gmra.mrb[10].mxu0 %v8241_v35  ;;  %v7232_v35 = vpack.c.bf16 %v8296_v48, %v8294_v41 }
 0x2d5   : > { %7219 = vmatpush3.bf16.msra.mxu0 %v8330_v7  ;;  %6848 = vmatprep.mubr.f32.mxu0 %v5128_v26 }
 0x2d6   : > { %7221 = vmatprep.subr.bf16.mxu0 %v7220_v40 }
 0x2d8   : > { %6849 = vmatmul.mubr.f32.vlgmr.msra.gmra.mrb[8].mxu0 %v5138_v46 }
 0x2d9   : > { %6851 = vmatprep.mubr.f32.mxu0 %v5148_v53  ;;  %7223 = vmatpush3.bf16.msra.mxu0 %v7220_v40 }
 0x2da   : > { %7225 = vmatprep.subr.bf16.mxu0 %v7224_v10 }
 0x2dc   : > { %6852 = vmatmul.mubr.f32.gmra.mrb[10].mxu0 %v5158_v17 }
 0x2dd   : > { %7227 = vmatpush3.bf16.msra.mxu0 %v7224_v10  ;;  %6862 = vmatprep.mubr.f32.mxu0 %v8284_v30 }
 0x2de   : > { %7229 = vmatprep.subr.bf16.mxu0 %v7228_v62 }
 0x2e0   : > { %6863 = vmatmul.mubr.f32.vlgmr.msra.gmra.mrb[8].mxu0 %v8291_v31 }
 0x2e1   : > { %6865 = vmatprep.mubr.f32.mxu0 %v8302_v50  ;;  %7231 = vmatpush3.bf16.msra.mxu0 %v7228_v62 }
 0x2e2   : > { %7233 = vmatprep.subr.bf16.mxu0 %v7232_v35 }
 0x2e4   : > { %6866 = vmatmul.mubr.f32.gmra.mrb[10].mxu0 %v8318_v44 }
 0x2e5   : > { %7235 = vmatpush3.bf16.msra.mxu0 %v7232_v35  ;;  %6876 = vmatprep.mubr.f32.mxu0 %v8299_v42 }
 0x2e6   : > { %7237 = vmatprep.subr.bf16.mxu0 %v8307_v32 }
 0x2e8   : > { %6877 = vmatmul.mubr.f32.vlgmr.msra.gmra.mrb[8].mxu0 %v8316_v34 }
 0x2e9   : > { %6879 = vmatprep.mubr.f32.mxu0 %v8324_v21  ;;  %7239 = vmatpush3.bf16.msra.mxu0 %v8307_v32 }
 0x2ea   : > { %7241 = vmatprep.subr.bf16.mxu0 %v8330_v7 }
 0x2ec   : > { %6880 = vmatmul.mubr.f32.gmra.mrb[10].mxu0 %v5155_v33 }
 0x2ed   : > { %7243 = vmatpush3.bf16.msra.mxu0 %v8330_v7  ;;  %6890 = vmatprep.mubr.f32.mxu0 %v5126_v27 }
 0x2ee   : > { %7245 = vmatprep.subr.bf16.mxu0 %v7244_v15 }
 0x2f0   : > { %6891 = vmatmul.mubr.f32.vlgmr.msra.gmra.mrb[8].mxu0 %v5136_v6 }
 0x2f1   : > { %6893 = vmatprep.mubr.f32.mxu0 %v5146_v37  ;;  %7247 = vmatpush3.bf16.msra.mxu0 %v7244_v15 }
 0x2f2   : > { %7249 = vmatprep.subr.bf16.mxu0 %v7248_v58 }
 0x2f4   : > { %6894 = vmatmul.mubr.f32.gmra.mrb[10].mxu0 %v5156_v47 }
 0x2f5   : > { %7251 = vmatpush3.bf16.msra.mxu0 %v7248_v58  ;;  %6904 = vmatprep.mubr.f32.mxu0 %v8284_v30 }
 0x2f6   : > { %7253 = vmatprep.subr.bf16.mxu0 %v8307_v32 }
 0x2f8   : > { %6905 = vmatmul.mubr.f32.vlgmr.msra.gmra.mrb[8].mxu0 %v8291_v31 }
 0x2f9   : > { %6907 = vmatprep.mubr.f32.mxu0 %v8302_v50  ;;  %7255 = vmatpush3.bf16.msra.mxu0 %v8307_v32 }
 0x2fa   : > { %7257 = vmatprep.subr.bf16.mxu0 %v8330_v7 }
 0x2fc   : > { %6908 = vmatmul.mubr.f32.gmra.mrb[10].mxu0 %v8318_v44 }
 0x2fd   : > { %7259 = vmatpush3.bf16.msra.mxu0 %v8330_v7  ;;  %6918 = vmatprep.mubr.f32.mxu0 %v8284_v30  ;;  %v7459_v30 = vld [vmem:[#allocation2 + $0x10] sm:$0xff] }
 0x300   : > { %6919 = vmatmul.mubr.f32.vlgmr.msra.gmra.mrb[8].mxu0 %v8291_v31 }
 0x301   : > { %6921 = vmatprep.mubr.f32.mxu0 %v8302_v50 }
 0x304   : > { %6922 = vmatmul.mubr.f32.gmra.mrb[10].mxu0 %v8318_v44 }
 0x3d3   : > { %v6920_v22 = vpop.f32.mrb[8].mxu0 }
 0x3d4   : > { %v5677_v1 = vadd.f32 %v6920_v22, %v5926_v63  ;;  %v5647_v56 = vpop.f32.mrb[9].mxu0 }
 0x3d5   : > { %v5676_v8 = vadd.f32 %v5926_v63, %v5647_v56 }
 0x3d6   : > { %v5682_v20 = vadd.f32 %v7456_v51, %v5677_v1 }
 0x3d7   : > { %v5681_v5 = vadd.f32 %v7457_v57, %v5676_v8  ;;  %v6923_v11 = vpop.f32.mrb[10].mxu0 }
 0x3d8   : > { %v5689_v4 = vsel %vm8392_vm3, %v5682_v20, %v5677_v1  ;;  %v5679_v24 = vadd.f32 %v6923_v11, %v5926_v63  ;;  %v5659_v61 = vpop.f32.mrb[11].mxu0  ;;  %5699 = sbr.rel (%p5927_p7) target bundleno = 1140 (0x474), region = 80 }
 0x3d9   : > { %5693 = vst.msk [vmem:[#allocation2 + $0x8] sm:$0xff] %vm1266_vm2, %v5689_v4  ;;  %v5688_v2 = vsel %vm8392_vm3, %v5681_v5, %v5676_v8  ;;  %v5678_v3 = vadd.f32 %v5926_v63, %v5659_v61  ;;  %v5708_v42 = vmul.f32 (!%p5927_p7), %v5928_v43, %v5689_v4 }
 0x3da   : > { %5692 = vst.msk [vmem:[#allocation2] sm:$0xff] %vm1266_vm2, %v5688_v2  ;;  %v5684_v25 = vadd.f32 %v7458_v59, %v5679_v24  ;;  %v5707_v41 = vmul.f32 (!%p5927_p7), %v5928_v43, %v5688_v2 }
 0x3db   : > { %v5683_v28 = vadd.f32 %v7459_v30, %v5678_v3  ;;  %v5714_v55 = vsel (!%p5927_p7), %vm1266_vm2, %v5708_v42, 0.0 }
 0x3dc   : > { %v5691_v38 = vsel %vm8392_vm3, %v5684_v25, %v5679_v24  ;;  %v5711_v50 = vsel (!%p5927_p7), %vm1266_vm2, %v5707_v41, 0.0 }
 0x3dd   : > { %5695 = vst.msk [vmem:[#allocation2 + $0x18] sm:$0xff] %vm1266_vm2, %v5691_v38  ;;  %v5690_v49 = vsel %vm8392_vm3, %v5683_v28, %v5678_v3  ;;  %v5710_v48 = vmul.f32 (!%p5927_p7), %v5928_v43, %v5691_v38  ;;  %5712 = vadd.xlane.f32.xlu0 (!%p5927_p7), %v5711_v50 }
 0x3de   : > { %5694 = vst.msk [vmem:[#allocation2 + $0x10] sm:$0xff] %vm1266_vm2, %v5690_v49  ;;  %v5709_v31 = vmul.f32 (!%p5927_p7), %v5928_v43, %v5690_v49 }
 0x3df   : > { %v5720_v32 = vsel %vm1266_vm2, %v5710_v48, 0.0 }
 0x3e0   : > { %v5717_v16 = vsel %vm1266_vm2, %v5709_v31, 0.0 }
 0x3e1   : > { %5718 = vadd.xlane.f32.xlu1 %v5717_v16  ;;  %5715 = vadd.xlane.f32.xlu0 %v5714_v55 }
 0x3e5   : > { %5721 = vadd.xlane.f32.xlu1 %v5720_v32 }
 0x46a   : > { %v5713_v34 = vpop.xlane.xlu0 %5712 }
 0x46b   : > { %5724 = vst.msk [vmem:[%s8470_s19] sm:$0xff] %vm5723_vm4, %v5713_v34 }
 0x46e   : > { %v5719_v60 = vpop.xlane.xlu1 %5718  ;;  %v5716_v9 = vpop.xlane.xlu0 %5715 }
 0x46f   : > { %5726 = vst.msk [vmem:[%s8470_s19 + $0x10] sm:$0xff] %vm5723_vm4, %v5719_v60  ;;  %5725 = vst.msk [vmem:[%s8470_s19 + $0x8] sm:$0xff] %vm5723_vm4, %v5716_v9 }
 0x472   : > { %v5722_v44 = vpop.xlane.xlu1 %5721 }
 0x473   : > { %5727 = vst.msk [vmem:[%s8470_s19 + $0x18] sm:$0xff] %vm5723_vm4, %v5722_v44 }
 0x474 PF: > { %s8471_s30 = sld [smem:[#allocation6_spill]]  ;;  %s8472_s25 = sld [smem:[#allocation5_spill]] }
 0x475   : > { %s8473_s26 = sld [smem:[#allocation7_spill]] }
 0x47a   : > { %s23_s27 = sadd.s32 1, %s8471_s30  }
 0x47b   : > { %p20_p8 = scmp.ge.s32.totalorder %s23_s27, 7  }
 0x47d   :  { %22 = sbr.rel (!%p20_p8) target bundleno = 7 (0x7), region = 140 }

</bundles_post_ra>
